<compile_context>
chip_gen: v7x
topology: tpu7x:2x2x1
jax: 0.10.0
libtpu: 0.0.40
codegen_flags: <defaults>
</compile_context>

<pallas_src>
import jax
import jax.numpy as jnp
from jax.experimental import pallas as pl
from jax.experimental.pallas import tpu as pltpu


_VMEM_LIMIT = 48 * 1024 * 1024


def _round_up(x, m):
    return (x + m - 1) // m * m


def _pick_row_tile(M):
    # Prefer big row tiles (amortize ~0.35 us per grid step) but keep the row
    # grid >= 2 so both v7x TensorCores get work under "parallel" semantics.
    for tm in (512, 256, 128, 64, 32, 16, 8):
        if _round_up(M, tm) // tm >= 2:
            return tm
    return 8


# ----------------- kernel 1: 1x1 conv (matmul) + BN partial stats ------------
def conv1_stats_kernel(x_ref, w_ref, y_ref, stats_ref):
    # Whole W1 is VMEM-resident -> single MXU matmul per row tile, no scratch.
    acc = jnp.dot(x_ref[...], w_ref[...], preferred_element_type=jnp.float32)
    y_ref[...] = acc.astype(y_ref.dtype)                       # bf16 writeback
    s = jnp.sum(acc, axis=0, keepdims=True)                    # (1, C) sum
    s2 = jnp.sum(acc * acc, axis=0, keepdims=True)             # (1, C) sumsq
    stats_ref[...] = jnp.concatenate([s, s2], axis=0)[None]    # (1, 2, C)


def _conv1_with_stats(x, w, *, tm):
    M, K = x.shape
    _, N = w.shape
    gm = M // tm
    return pl.pallas_call(
        conv1_stats_kernel,
        out_shape=(jax.ShapeDtypeStruct((M, N), jnp.bfloat16),
                   jax.ShapeDtypeStruct((gm, 2, N), jnp.float32)),
        grid_spec=pltpu.PrefetchScalarGridSpec(
            num_scalar_prefetch=0,
            grid=(gm,),
            in_specs=[pl.BlockSpec((tm, K), lambda i: (i, 0)),
                      pl.BlockSpec((K, N), lambda i: (0, 0))],    # resident W1
            out_specs=[pl.BlockSpec((tm, N), lambda i: (i, 0)),
                       pl.BlockSpec((1, 2, N), lambda i: (i, 0, 0))]),
        compiler_params=pltpu.CompilerParams(
            dimension_semantics=("parallel",),
            vmem_limit_bytes=_VMEM_LIMIT),
    )(x, w)


# ---------- kernel 2: fused BN affine + ReLU + 1x1 conv (matmul) + bias ------
def bn_relu_conv2_kernel(y_ref, scale_ref, shift_ref, w_ref, b_ref, o_ref):
    a = y_ref[...].astype(jnp.float32) * scale_ref[...] + shift_ref[...]
    a = jnp.maximum(a, 0.0)                                    # ReLU
    o_ref[...] = (jnp.dot(a.astype(jnp.bfloat16), w_ref[...],
                          preferred_element_type=jnp.float32)
                  + b_ref[...]).astype(o_ref.dtype)


def _bn_relu_conv2(y, scale, shift, w, b, *, tm):
    M, K = y.shape
    _, N = w.shape
    gm = M // tm
    return pl.pallas_call(
        bn_relu_conv2_kernel,
        out_shape=jax.ShapeDtypeStruct((M, N), jnp.float32),
        grid_spec=pltpu.PrefetchScalarGridSpec(
            num_scalar_prefetch=0,
            grid=(gm,),
            in_specs=[pl.BlockSpec((tm, K), lambda i: (i, 0)),
                      pl.BlockSpec((1, K), lambda i: (0, 0)),
                      pl.BlockSpec((1, K), lambda i: (0, 0)),
                      pl.BlockSpec((K, N), lambda i: (0, 0)),    # resident W2
                      pl.BlockSpec((1, N), lambda i: (0, 0))],
            out_specs=pl.BlockSpec((tm, N), lambda i: (i, 0))),
        compiler_params=pltpu.CompilerParams(
            dimension_semantics=("parallel",),
            vmem_limit_bytes=_VMEM_LIMIT),
    )(y, scale, shift, w, b)


# ----------------------------------- forward ---------------------------------
def prediction_mlp_forward(x_nchw, params, *, eps=1e-5):
    """Matches prediction_MLP.forward (training-mode BN).  x_nchw: (N,C,H,W)."""
    (w1, b1, g1, be1), (w2, b2) = params
    del b1  # folded analytically into the BN shift (cancels under mean subtraction)
    N, Cin, H, W = x_nchw.shape
    Chid, Cout = w1.shape[0], w2.shape[0]
    Hp, Wp = H + 2, W + 2                         # layer1: 1x1 conv, padding=1
    M = N * Hp * Wp

    tm = _pick_row_tile(M)
    Mp = _round_up(M, tm)
    # Pad channels to multiples of 256 (lane-dense; keeps the 256-wide MXU of
    # v6e/v7x fully fed).  Padded rows/cols contribute exactly zero to stats
    # and matmuls.
    Cin_p, Chid_p, Cout_p = (_round_up(c, 256) for c in (Cin, Chid, Cout))

    # TODO(synk): fold the NCHW->NHWC transpose + spatial zero-pad into kernel 1
    # (NHWC end-to-end / masked border stores) to drop these XLA HBM passes.
    x = jnp.transpose(x_nchw, (0, 2, 3, 1)).astype(jnp.bfloat16)
    x = jnp.pad(x, ((0, 0), (1, 1), (1, 1), (0, Cin_p - Cin)))  # spatial + channel pad
    x = x.reshape(M, Cin_p)
    x = jnp.pad(x, ((0, Mp - M), (0, 0)))                       # rows to the tile

    w1_p = jnp.pad(w1.reshape(Chid, Cin).T,
                   ((0, Cin_p - Cin), (0, Chid_p - Chid))).astype(jnp.bfloat16)
    w2_p = jnp.pad(w2.reshape(Cout, Chid).T,
                   ((0, Chid_p - Chid), (0, Cout_p - Cout))).astype(jnp.bfloat16)

    # ---- layer1 conv (bias folded into BN shift) + per-row-tile BN stats.
    y, stats = _conv1_with_stats(x, w1_p, tm=tm)

    # ---- finalize BN (global biased stats over the real M rows; tiny, in JAX).
    s = jnp.sum(stats[:, 0, :Chid], axis=0)
    s2 = jnp.sum(stats[:, 1, :Chid], axis=0)
    mean = s / M                                   # mean of conv output (pre-bias)
    var = jnp.maximum(s2 / M - mean * mean, 0.0)   # bias shift leaves var unchanged
    scale = g1 * jax.lax.rsqrt(var + eps)
    shift = be1 - mean * scale                     # layer1 conv bias cancels under BN
    scale_p = jnp.pad(scale, (0, Chid_p - Chid)).reshape(1, Chid_p)
    shift_p = jnp.pad(shift, (0, Chid_p - Chid)).reshape(1, Chid_p)
    b2_p = jnp.pad(b2, (0, Cout_p - Cout)).reshape(1, Cout_p)

    # ---- layer2: fused BN-affine + ReLU + 1x1 conv + bias.
    out = _bn_relu_conv2(y, scale_p, shift_p, w2_p, b2_p, tm=tm)

    out = out[:M, :Cout].reshape(N, Hp, Wp, Cout)
    return jnp.transpose(out, (0, 3, 1, 2))        # NHWC -> NCHW


# ------------------------------ params & reference ---------------------------
def init_params(key, in_dim, hidden_dim, out_dim):
    k1, k2, k3, k4, k5, k6 = jax.random.split(key, 6)
    w1 = jax.random.normal(k1, (hidden_dim, in_dim, 1, 1), jnp.float32) / jnp.sqrt(in_dim)
    b1 = 0.1 * jax.random.normal(k2, (hidden_dim,), jnp.float32)
    g1 = 1.0 + 0.1 * jax.random.normal(k3, (hidden_dim,), jnp.float32)
    be1 = 0.1 * jax.random.normal(k4, (hidden_dim,), jnp.float32)
    w2 = jax.random.normal(k5, (out_dim, hidden_dim, 1, 1), jnp.float32) / jnp.sqrt(hidden_dim)
    b2 = 0.1 * jax.random.normal(k6, (out_dim,), jnp.float32)
    return (w1, b1, g1, be1), (w2, b2)


def _ref_forward(x_nchw, params, eps=1e-5):
    """Pure-JAX f32 reference of the PyTorch forward."""
    (w1, b1, g1, be1), (w2, b2) = params
    x = jnp.transpose(x_nchw, (0, 2, 3, 1))
    x = jnp.pad(x, ((0, 0), (1, 1), (1, 1), (0, 0)))
    y = jnp.einsum('nhwc,oc->nhwo', x, w1[:, :, 0, 0]) + b1
    mean = jnp.mean(y, axis=(0, 1, 2), keepdims=True)
    var = jnp.mean((y - mean) ** 2, axis=(0, 1, 2), keepdims=True)
    y = (y - mean) * jax.lax.rsqrt(var + eps) * g1 + be1
    y = jnp.maximum(y, 0.0)
    z = jnp.einsum('nhwc,oc->nhwo', y, w2[:, :, 0, 0]) + b2
    return jnp.transpose(z, (0, 3, 1, 2))


if __name__ == "__main__":
    # Small shapes consistent with the module (defaults 2048/512/2048 scaled down).
    N, in_dim, H, W = 2, 4, 16, 16
    hidden_dim, out_dim = 32, 64

    key = jax.random.PRNGKey(0)
    kx, kp = jax.random.split(key)
    x = jax.random.normal(kx, (N, in_dim, H, W), jnp.float32)
    params = init_params(kp, in_dim, hidden_dim, out_dim)

    out = jax.block_until_ready(prediction_mlp_forward(x, params))
    assert out.shape == (N, out_dim, H + 2, W + 2), out.shape

    ref = jax.block_until_ready(_ref_forward(x, params))
    max_err = float(jnp.max(jnp.abs(out - ref)))
    # bf16 MXU inputs + bf16 intermediate activation (f32 accumulation / BN math)
    # -> loosened tolerance.
    assert jnp.allclose(out, ref, rtol=5e-2, atol=5e-2), max_err

    print("KERNEL_OK")
</pallas_src>

<mosaic_0001>
module attributes {stable_mosaic.version = 11 : i64} {
  func.func @conv1_stats_kernel(%arg0: i32, %arg1: memref<512x256xbf16, #tpu.memory_space<vmem>>, %arg2: memref<256x256xbf16, #tpu.memory_space<vmem>>, %arg3: memref<512x256xbf16, #tpu.memory_space<vmem>>, %arg4: memref<1x2x256xf32, #tpu.memory_space<vmem>>) attributes {dimension_semantics = [#tpu.dimension_semantics<parallel>], iteration_bounds = array<i64: 2>, scalar_prefetch = 0 : i64, scratch_operands = 0 : i64, tpu.core_type = #tpu.core_type<tc>, window_params = [{transform_indices = @transform_0, window_bounds = array<i64: 512, 256>}, {pipeline_mode = #tpu.pipeline_mode<synchronous>, transform_indices = @transform_1, window_bounds = array<i64: 256, 256>}, {transform_indices = @transform_2, window_bounds = array<i64: 512, 256>}, {transform_indices = @transform_3, window_bounds = array<i64: 1, 2, 256>}]} {
    %c0 = arith.constant 0 : index
    %c0_0 = arith.constant 0 : index
    %0 = vector.load %arg1[%c0, %c0_0] : memref<512x256xbf16, #tpu.memory_space<vmem>>, vector<512x256xbf16>
    %c0_1 = arith.constant 0 : index
    %c0_2 = arith.constant 0 : index
    %1 = vector.load %arg2[%c0_1, %c0_2] : memref<256x256xbf16, #tpu.memory_space<vmem>>, vector<256x256xbf16>
    %cst = arith.constant dense<0.000000e+00> : vector<512x256xf32>
    %2 = tpu.matmul %0, %1, %cst {dimension_numbers = #tpu.dot_dimension_numbers<[1], [0], [0], [1], [0, 0, 1, 1], [], []>} : vector<512x256xbf16>, vector<256x256xbf16>, vector<512x256xf32> -> vector<512x256xf32>
    %3 = arith.truncf %2 : vector<512x256xf32> to vector<512x256xbf16>
    %c0_3 = arith.constant 0 : index
    %c0_4 = arith.constant 0 : index
    %4 = vector.load %arg3[%c0_3, %c0_4] : memref<512x256xbf16, #tpu.memory_space<vmem>>, vector<512x256xbf16>
    tpu.vector_store %arg3[%c0_3, %c0_4], %3 {strides = array<i32>} : memref<512x256xbf16, #tpu.memory_space<vmem>>, vector<512x256xbf16>,
    %cst_5 = arith.constant dense<0.000000e+00> : vector<256xf32>
    %5 = vector.multi_reduction <add>, %2, %cst_5 [0] : vector<512x256xf32> to vector<256xf32>
    %6 = vector.shape_cast %5 : vector<256xf32> to vector<1x256xf32>
    %7 = arith.mulf %2, %2 : vector<512x256xf32>
    %cst_6 = arith.constant dense<0.000000e+00> : vector<256xf32>
    %8 = vector.multi_reduction <add>, %7, %cst_6 [0] : vector<512x256xf32> to vector<256xf32>
    %9 = vector.shape_cast %8 : vector<256xf32> to vector<1x256xf32>
    %10 = tpu.concatenate %6, %9 in 0 : vector<1x256xf32>, vector<1x256xf32> -> vector<2x256xf32>
    %11 = vector.shape_cast %10 : vector<2x256xf32> to vector<1x2x256xf32>
    %c0_7 = arith.constant 0 : index
    %c0_8 = arith.constant 0 : index
    %c0_9 = arith.constant 0 : index
    %12 = vector.load %arg4[%c0_7, %c0_8, %c0_9] : memref<1x2x256xf32, #tpu.memory_space<vmem>>, vector<1x2x256xf32>
    tpu.vector_store %arg4[%c0_7, %c0_8, %c0_9], %11 {strides = array<i32>} : memref<1x2x256xf32, #tpu.memory_space<vmem>>, vector<1x2x256xf32>,
    return
  }
  func.func @transform_0(%arg0: i32) -> (i32, i32) {
    %c0_i32 = arith.constant 0 : i32
    %c0_i32_0 = arith.constant 0 : i32
    return %arg0, %c0_i32 : i32, i32
  }
  func.func @transform_1(%arg0: i32) -> (i32, i32) {
    %c0_i32 = arith.constant 0 : i32
    %c0_i32_0 = arith.constant 0 : i32
    %c0_i32_1 = arith.constant 0 : i32
    return %c0_i32, %c0_i32_0 : i32, i32
  }
  func.func @transform_2(%arg0: i32) -> (i32, i32) {
    %c0_i32 = arith.constant 0 : i32
    %c0_i32_0 = arith.constant 0 : i32
    return %arg0, %c0_i32 : i32, i32
  }
  func.func @transform_3(%arg0: i32) -> (i32, i32, i32) {
    %c0_i32 = arith.constant 0 : i32
    %c0_i32_0 = arith.constant 0 : i32
    %c0_i32_1 = arith.constant 0 : i32
    return %arg0, %c0_i32, %c0_i32_0 : i32, i32, i32
  }
}

</mosaic_0001>

<bundles_post_ra>
// kernel: tpu_custom_call.1
= control target key start
LH: loop header
LB: loop body
LE: loop exit
PB: predicated region body
PF: predicated region fallthrough
CT: control target
= control target key end

     0   :  { %9 = vsyncpa [#allocation3], 0  ;;  %s3606_s0 = inlined_call_operand.hbm [shape: bf16[1024,256], index: 0, kind: input, shape index: {}]   ;;  %s3607_s1 = inlined_call_operand.hbm [shape: bf16[256,256], index: 1, kind: input, shape index: {}]   ;;  %s3608_s2 = inlined_call_operand.hbm [shape: bf16[1024,256], index: 2, kind: output, shape index: {0}]   ;;  %s3609_s3 = inlined_call_operand.hbm [shape: f32[2,2,256], index: 3, kind: output, shape index: {1}]  }
   0x1   :  { %11 = vsyncpa [#allocation3 + $0x1], 0 }
   0x2   :  { %12 = vsyncpa [#allocation6], 0 }
   0x3   :  { %13 = vsyncpa [#allocation4], 0 }
   0x4   :  { %15 = vsyncpa [#allocation4 + $0x1], 0 }
   0x5   :  { %16 = vsyncpa [#allocation9], 0 }
   0x6   :  { %18 = vsyncpa [#allocation9 + $0x1], 0  ;;  %s2847_s12 = smov 0   ;;  %s2849_s13 = smov 0  }
   0x7   :  { %s2851_s14 = smov 0   ;;  %s2853_s15 = smov 0  }
   0x8 LB: > { %s2868_s16 = sadd.s32 4294967295, %s2817_s15   ;;  %s2163_s17 = sadd.s32 4294967294, %s2817_s15   ;;  %s2817_s15 = sphi %s2853_s15, %s3701_s15   ;;  %s2813_s14 = sphi %s2851_s14, %s3700_s14   ;;  %s2809_s13 = sphi %s2849_s13, %s3699_s13   ;;  %s2805_s12 = sphi %s2847_s12, %s3698_s12  }
   0x9   : > { %p44_p0 = scmp.ne.s32.totalorder %s2809_s13, %s2805_s12  ;;  %p3610_p1 = scmp.eq.s32.totalorder %s2868_s16, 0 }
   0xa   : > { %p95_p3 = scmp.eq.s32.totalorder %s2163_s17, 1  ;;  %p2164_p5 = scmp.ge.s32.totalorder %s2817_s15, 1 }
   0xb   : > { %p2877_p4 = por %p3610_p1, %p44_p0  ;;  %p128_p7 = scmp.lt.s32.totalorder %s2817_s15, 3 }
   0xc   : > { %p2882_p6 = por %p95_p3, %p44_p0  ;;  %s2819_s21 = smov [#allocation5]  }
   0xd   : > { %s3649_s18 = scalar_select %p2877_p4, 1, 0 }
   0xe   : > { %s3650_s19 = scalar_select %p2882_p6, 1, 0 }
   0xf   : > { %p2887_p8 = pnand %p2164_p5, %p128_p7  ;;  %s140_s22 = sshll.u32 %s2819_s21, 4  ;;  %s2891_s22 = int_to_ptr.vmem [resolvable:$true] %s140_s22 }
  0x10   : > { %s2903_s24 = sadd.s32 1, %s2817_s15   ;;  %s31_s25 = sadd.s32 1, %s2813_s14 }
  0x11   : > { %s3651_s20 = scalar_select %p2887_p8, 1, 0 }
  0x12   : > { %p2457_p9 = pneg %p2887_p8  ;;  %s28_s26 = ssub.s32 %s2817_s15, %s2903_s24 }
  0x13   : > { %s2657_s29 = scalar_lea.hbm %s3607_s1, 4096 }
  0x14   : > { %p2898_p11 = pnand %p2457_p9, %p3610_p1  ;;  %p2658_p12 = scmp.ne.s32.totalorder %s3607_s1, %s2657_s29 }
  0x15   : > { %p2664_p5 = scmp.lt.u32.totalorder %s2657_s29, %s3607_s1 }
  0x16   : > { %p2659_p13 = pneg %p2898_p11 }
  0x18   : > { %p2660_p0 = pnand %p2659_p13, %p2658_p12 }
  0x1a   : > { %p2661_p3 = pneg %p2660_p0 }
  0x1c   : > { %p2666_p7 = pnand %p2664_p5, %p2661_p3 }
  0x1e   : > { %2669 = shalt.err (!%p2666_p7)
}
  0x1f   : > { %s2670_s7 = scalar_lea.vmem %s2891_s22, 4096  ;;  %p2678_p2 = scmp.lt.s32.totalorder %s2891_s22, %s2891_s22 }
  0x20   : > { %p2671_p9 = scmp.ne.s32.totalorder %s2891_s22, %s2670_s7  ;;  %p2679_p6 = scmp.lt.s32.totalorder %s2670_s7, %s2670_s7 }
  0x22   : > { %p2673_p10 = pnand %p2671_p9, %p2659_p13  ;;  %p2680_p4 = por %p2679_p6, %p2678_p2 }
  0x24   : > { %p2674_p1 = pneg %p2673_p10 }
  0x26   : > { %p2681_p8 = pnand %p2680_p4, %p2674_p1 }
  0x28   : > { %2684 = shalt.err (!%p2681_p8)
}
  0x29   : > { %s2820_s8 = smov 128   ;;  %s2821_s9 = smov 8  }
  0x2a   : > { %2460 = dma.hbm_to_vmem [thread:$0]  (!%p2898_p11), %s3607_s1, 4096, %s2891_s22, [#allocation6], %s2820_s8, %s2820_s8, %s2821_s9  }
  0x2b   : > { %p29_p1 = scmp.eq.s32.totalorder %s28_s26, 0  ;;  %p38_p2 = scmp.ne.s32.totalorder %s2813_s14, %s2809_s13 }
  0x2c   : > { %p39_p4 = scmp.eq.s32.totalorder %s2817_s15, 0  ;;  %p2473_p6 = scmp.lt.s32.totalorder %s2817_s15, 2 }
  0x2d   : > { %s2937_s17 = scalar_select %p29_p1, %s2813_s14, %s31_s25  }
  0x2e   : > { %p40_p8 = por %p39_p4, %p38_p2  ;;  %p3653_p10 = scmp.eq.s32.totalorder %s2868_s16, 1 }
  0x2f   : > { %s154_s23 = sand.u32 1, %s2813_s14   ;;  %s2347_s27 = sshll.u32 %s2817_s15, 13 }
  0x30   : > { %p2941_p12 = por %p3653_p10, %p38_p2  ;;  %s2167_s28 = sshll.u32 %s154_s23, 9 }
  0x31   : > { %s2950_s4 = scalar_lea.hbm %s3606_s0, %s2347_s27  ;;  %s158_s22 = scalar_lea.vmem [#allocation2], %s2167_s28 }
  0x32   : > { %s166_s25 = sshll.u32 %s158_s22, 4  ;;  %p2952_p11 = pnand %p2473_p6, %p40_p8  ;;  %s2956_s25 = int_to_ptr.vmem [resolvable:$true] %s166_s25 }
  0x33   : > { %s2958_s5 = scalar_lea.sflag [#allocation3], %s154_s23  ;;  %s2685_s6 = scalar_lea.hbm %s2950_s4, 8192 }
  0x34   : > { %p2686_p13 = scmp.ne.s32.totalorder %s2950_s4, %s2685_s6  ;;  %p2687_p0 = pneg %p2952_p11 }
  0x35   : > { %s2690_s11 = scalar_lea.hbm %s3606_s0, 16384  ;;  %p2691_p7 = scmp.lt.u32.totalorder %s2950_s4, %s3606_s0 }
  0x36   : > { %p2688_p3 = pnand %p2687_p0, %p2686_p13  ;;  %p2692_p9 = scmp.lt.u32.totalorder %s2690_s11, %s2685_s6 }
  0x37   : > { %p2694_p2 = scmp.lt.u32.totalorder %s2685_s6, %s2950_s4 }
  0x38   : > { %p2689_p5 = pneg %p2688_p3  ;;  %p2693_p1 = por %p2692_p9, %p2691_p7 }
  0x3a   : > { %p2695_p4 = por %p2694_p2, %p2693_p1 }
  0x3c   : > { %p2696_p6 = pnand %p2695_p4, %p2689_p5 }
  0x3e   : > { %2699 = shalt.err (!%p2696_p6)
}
  0x3f   : > { %s2700_s23 = scalar_lea.vmem %s2956_s25, 8192  ;;  %s2822_s29 = smov [#allocation2]  }
  0x40   : > { %p2701_p8 = scmp.ne.s32.totalorder %s2956_s25, %s2700_s23  ;;  %s2705_s30 = sshll.u32 %s2822_s29, 4  ;;  %s2706_s30 = int_to_ptr.vmem [resolvable:$false] %s2705_s30 }
  0x41   : > { %s2707_s22 = scalar_lea.vmem %s2706_s30, 16384  ;;  %p2708_p3 = scmp.lt.s32.totalorder %s2956_s25, %s2706_s30 }
  0x42   : > { %p2703_p10 = pnand %p2701_p8, %p2687_p0  ;;  %p2709_p7 = scmp.lt.s32.totalorder %s2707_s22, %s2700_s23 }
  0x44   : > { %p2704_p13 = pneg %p2703_p10  ;;  %p2710_p9 = por %p2709_p7, %p2708_p3 }
  0x46   : > { %p2711_p1 = pnand %p2710_p9, %p2704_p13 }
  0x48   : > { %2714 = shalt.err (!%p2711_p1)
}
  0x49   : > { %2464 = dma.hbm_to_vmem [thread:$0]  (!%p2952_p11), %s2950_s4, 8192, %s2956_s25, %s2958_s5, %s2820_s8, %s2820_s8, %s2821_s9  }
  0x4a   : > { %p3656_p0 = scmp.ne.s32.totalorder %s3651_s20, 0 }
  0x4c   : > { %178 = sbr.rel (%p3656_p0) target bundleno = 599 (0x257), region = 28 }
  0x53   : > { %s2992_s6 = sand.u32 1, %s2809_s13   ;;  %p3657_p5 = scmp.ne.s32.totalorder %s3649_s18, 0 }
  0x54   : > { %s2172_s7 = sshll.u32 %s2992_s6, 9  ;;  %s181_s10 = scalar_lea.sflag [#allocation3], %s2992_s6 }
  0x55   : > { %s2998_s26 = scalar_lea.vmem [#allocation2], %s2172_s7 }
  0x56   : > { %2788 = dma.done.wait (%p3657_p5), %s181_s10, 8192  }
  0x57   : > { %2790 = vsyncadd (%p3657_p5), %s181_s10, 4294959104  ;;  %p3658_p11 = scmp.eq.s32.totalorder %s2868_s16, 0 }
  0x59   : > { %2792 = dma.done.wait (%p3658_p11), [#allocation6], 4096   ;;  %p3659_p2 = pmov %p3658_p11 }
  0x5a   : > { %v2513_v0 = vld [vmem:[#allocation5 + $0x4] ss:$8 sps:$4 sm:$0xff]   ;;  %v2515_v1 = vld [vmem:[#allocation5] ss:$8 sps:$4 sm:$0xff]   ;;  %v2516_v2 = vld [vmem:[#allocation5 + $0x14] ss:$8 sps:$4 sm:$0xff]  }
  0x5b   : > { %2794 = vsyncadd (%p3659_p2), [#allocation6], 4294963200  ;;  %794 = vmatprep.subr.bf16.mxu0 %v2513_v0  ;;  %2415 = vmatprep.subr.bf16.mxu1 %v2513_v0  ;;  %v2518_v3 = vld [vmem:[#allocation5 + $0x10] ss:$8 sps:$4 sm:$0xff]   ;;  %v2519_v4 = vld [vmem:[#allocation5 + $0x24] ss:$8 sps:$4 sm:$0xff]  }
  0x5c   : > { %795 = vmatpush1.bf16.msra.mxu0 %v2515_v1  ;;  %2431 = vmatpush1.bf16.msra.mxu1 %v2515_v1  ;;  %v2521_v5 = vld [vmem:[#allocation5 + $0x20] ss:$8 sps:$4 sm:$0xff]   ;;  %v2522_v6 = vld [vmem:[#allocation5 + $0x34] ss:$8 sps:$4 sm:$0xff]   ;;  %v2524_v7 = vld [vmem:[#allocation5 + $0x30] ss:$8 sps:$4 sm:$0xff]  }
  0x5d   : > { %796 = vmatprep.subr.bf16.mxu0 %v2516_v2  ;;  %2416 = vmatprep.subr.bf16.mxu1 %v2516_v2  ;;  %v2525_v8 = vld [vmem:[#allocation5 + $0x44] ss:$8 sps:$4 sm:$0xff]   ;;  %v2527_v9 = vld [vmem:[#allocation5 + $0x40] ss:$8 sps:$4 sm:$0xff]   ;;  %v2528_v10 = vld [vmem:[#allocation5 + $0x54] ss:$8 sps:$4 sm:$0xff]  }
  0x5e   : > { %v2530_v11 = vld [vmem:[#allocation5 + $0x50] ss:$8 sps:$4 sm:$0xff]   ;;  %v2531_v12 = vld [vmem:[#allocation5 + $0x64] ss:$8 sps:$4 sm:$0xff]   ;;  %v2533_v14 = vld [vmem:[#allocation5 + $0x60] ss:$8 sps:$4 sm:$0xff]  }
  0x5f   : > { %v2563_v13 = vld [vmem:[%s2998_s26 + $0x4] ss:$8 sps:$4 sm:$0xff]   ;;  %v2534_v15 = vld [vmem:[#allocation5 + $0x74] ss:$8 sps:$4 sm:$0xff]   ;;  %v2536_v16 = vld [vmem:[#allocation5 + $0x70] ss:$8 sps:$4 sm:$0xff]  }
  0x60   : > { %797 = vmatpush1.bf16.msra.mxu0 %v2518_v3  ;;  %2432 = vmatpush1.bf16.msra.mxu1 %v2518_v3  ;;  %v2537_v17 = vld [vmem:[#allocation5 + $0x84] ss:$8 sps:$4 sm:$0xff]   ;;  %v2539_v18 = vld [vmem:[#allocation5 + $0x80] ss:$8 sps:$4 sm:$0xff]   ;;  %v2540_v19 = vld [vmem:[#allocation5 + $0x94] ss:$8 sps:$4 sm:$0xff]  }
  0x61   : > { %798 = vmatprep.subr.bf16.mxu0 %v2519_v4  ;;  %2417 = vmatprep.subr.bf16.mxu1 %v2519_v4  ;;  %v2587_v20 = vld [vmem:[%s2998_s26 + $0x104] ss:$8 sps:$4 sm:$0xff]   ;;  %v2542_v21 = vld [vmem:[#allocation5 + $0x90] ss:$8 sps:$4 sm:$0xff]   ;;  %v2545_v23 = vld [vmem:[#allocation5 + $0xa0] ss:$8 sps:$4 sm:$0xff]  }
  0x62   : > { %826 = vmatprep.mubr.bf16.mxu0 %v2563_v13  ;;  %v2543_v22 = vld [vmem:[#allocation5 + $0xa4] ss:$8 sps:$4 sm:$0xff]   ;;  %986 = vmatprep.mubr.bf16.mxu1 %v2587_v20  ;;  %v2546_v24 = vld [vmem:[#allocation5 + $0xb4] ss:$8 sps:$4 sm:$0xff]   ;;  %v2548_v25 = vld [vmem:[#allocation5 + $0xb0] ss:$8 sps:$4 sm:$0xff]  }
  0x63   : > { %v2549_v26 = vld [vmem:[#allocation5 + $0xc4] ss:$8 sps:$4 sm:$0xff]   ;;  %v2551_v27 = vld [vmem:[#allocation5 + $0xc0] ss:$8 sps:$4 sm:$0xff]   ;;  %v2552_v28 = vld [vmem:[#allocation5 + $0xd4] ss:$8 sps:$4 sm:$0xff]  }
  0x64   : > { %799 = vmatpush1.bf16.msra.mxu0 %v2521_v5  ;;  %2433 = vmatpush1.bf16.msra.mxu1 %v2521_v5  ;;  %v2554_v29 = vld [vmem:[#allocation5 + $0xd0] ss:$8 sps:$4 sm:$0xff]   ;;  %v2555_v30 = vld [vmem:[#allocation5 + $0xe4] ss:$8 sps:$4 sm:$0xff]   ;;  %v2557_v31 = vld [vmem:[#allocation5 + $0xe0] ss:$8 sps:$4 sm:$0xff]  }
  0x65   : > { %800 = vmatprep.subr.bf16.mxu0 %v2522_v6  ;;  %2418 = vmatprep.subr.bf16.mxu1 %v2522_v6  ;;  %v2558_v32 = vld [vmem:[#allocation5 + $0xf4] ss:$8 sps:$4 sm:$0xff]   ;;  %v2560_v33 = vld [vmem:[#allocation5 + $0xf0] ss:$8 sps:$4 sm:$0xff]   ;;  %v2561_v34 = vld [vmem:[%s2998_s26] ss:$8 sps:$4 sm:$0xff]  }
  0x66   : > { %v2585_v35 = vld [vmem:[%s2998_s26 + $0x100] ss:$8 sps:$4 sm:$0xff]   ;;  %v2564_v36 = vld [vmem:[%s2998_s26 + $0x14] ss:$8 sps:$4 sm:$0xff]   ;;  %v2566_v38 = vld [vmem:[%s2998_s26 + $0x10] ss:$8 sps:$4 sm:$0xff]  }
  0x67   : > { %v2591_v37 = vld [vmem:[%s2998_s26 + $0x114] ss:$8 sps:$4 sm:$0xff]   ;;  %v2593_v39 = vld [vmem:[%s2998_s26 + $0x110] ss:$8 sps:$4 sm:$0xff]   ;;  %v2567_v40 = vld [vmem:[%s2998_s26 + $0x24] ss:$8 sps:$4 sm:$0xff]  }
  0x68   : > { %801 = vmatpush1.bf16.msra.mxu0 %v2524_v7  ;;  %2434 = vmatpush1.bf16.msra.mxu1 %v2524_v7  ;;  %v2597_v41 = vld [vmem:[%s2998_s26 + $0x124] ss:$8 sps:$4 sm:$0xff]   ;;  %v2569_v42 = vld [vmem:[%s2998_s26 + $0x20] ss:$8 sps:$4 sm:$0xff]   ;;  %v2570_v44 = vld [vmem:[%s2998_s26 + $0x34] ss:$8 sps:$4 sm:$0xff]  }
  0x69   : > { %802 = vmatprep.subr.bf16.mxu0 %v2525_v8  ;;  %2419 = vmatprep.subr.bf16.mxu1 %v2525_v8  ;;  %v2599_v43 = vld [vmem:[%s2998_s26 + $0x120] ss:$8 sps:$4 sm:$0xff]   ;;  %v2603_v45 = vld [vmem:[%s2998_s26 + $0x134] ss:$8 sps:$4 sm:$0xff]   ;;  %v2572_v46 = vld [vmem:[%s2998_s26 + $0x30] ss:$8 sps:$4 sm:$0xff]  }
  0x6a   : > { %v2605_v47 = vld [vmem:[%s2998_s26 + $0x130] ss:$8 sps:$4 sm:$0xff]   ;;  %v2573_v48 = vld [vmem:[%s2998_s26 + $0x44] ss:$8 sps:$4 sm:$0xff]   ;;  %v2575_v50 = vld [vmem:[%s2998_s26 + $0x40] ss:$8 sps:$4 sm:$0xff]  }
  0x6b   : > { %v2609_v49 = vld [vmem:[%s2998_s26 + $0x144] ss:$8 sps:$4 sm:$0xff]   ;;  %v2611_v51 = vld [vmem:[%s2998_s26 + $0x140] ss:$8 sps:$4 sm:$0xff]   ;;  %v2576_v52 = vld [vmem:[%s2998_s26 + $0x54] ss:$8 sps:$4 sm:$0xff]  }
  0x6c   : > { %803 = vmatpush1.bf16.msra.mxu0 %v2527_v9  ;;  %2435 = vmatpush1.bf16.msra.mxu1 %v2527_v9  ;;  %v2615_v53 = vld [vmem:[%s2998_s26 + $0x154] ss:$8 sps:$4 sm:$0xff]   ;;  %v2578_v54 = vld [vmem:[%s2998_s26 + $0x50] ss:$8 sps:$4 sm:$0xff]   ;;  %v2579_v56 = vld [vmem:[%s2998_s26 + $0x64] ss:$8 sps:$4 sm:$0xff]  }
  0x6d   : > { %804 = vmatprep.subr.bf16.mxu0 %v2528_v10  ;;  %2420 = vmatprep.subr.bf16.mxu1 %v2528_v10  ;;  %v2617_v55 = vld [vmem:[%s2998_s26 + $0x150] ss:$8 sps:$4 sm:$0xff]   ;;  %v2621_v57 = vld [vmem:[%s2998_s26 + $0x164] ss:$8 sps:$4 sm:$0xff]   ;;  %v2581_v58 = vld [vmem:[%s2998_s26 + $0x60] ss:$8 sps:$4 sm:$0xff]  }
  0x6e   : > { %v2623_v59 = vld [vmem:[%s2998_s26 + $0x160] ss:$8 sps:$4 sm:$0xff]   ;;  %v2582_v60 = vld [vmem:[%s2998_s26 + $0x74] ss:$8 sps:$4 sm:$0xff]   ;;  %v2584_v62 = vld [vmem:[%s2998_s26 + $0x70] ss:$8 sps:$4 sm:$0xff]  }
  0x6f   : > { %v2627_v61 = vld [vmem:[%s2998_s26 + $0x174] ss:$8 sps:$4 sm:$0xff]   ;;  %v2629_v63 = vld [vmem:[%s2998_s26 + $0x170] ss:$8 sps:$4 sm:$0xff]   ;;  %v2588_v0 = vld [vmem:[%s2998_s26 + $0x84] ss:$8 sps:$4 sm:$0xff]  }
  0x70   : > { %805 = vmatpush1.bf16.msra.mxu0 %v2530_v11  ;;  %2436 = vmatpush1.bf16.msra.mxu1 %v2530_v11  ;;  %v2633_v1 = vld [vmem:[%s2998_s26 + $0x184] ss:$8 sps:$4 sm:$0xff]   ;;  %v2590_v2 = vld [vmem:[%s2998_s26 + $0x80] ss:$8 sps:$4 sm:$0xff]   ;;  %v2594_v4 = vld [vmem:[%s2998_s26 + $0x94] ss:$8 sps:$4 sm:$0xff]  }
  0x71   : > { %806 = vmatprep.subr.bf16.mxu0 %v2531_v12  ;;  %2421 = vmatprep.subr.bf16.mxu1 %v2531_v12  ;;  %v2635_v3 = vld [vmem:[%s2998_s26 + $0x180] ss:$8 sps:$4 sm:$0xff]   ;;  %v2636_v5 = vld [vmem:[%s2998_s26 + $0x194] ss:$8 sps:$4 sm:$0xff]   ;;  %v2596_v6 = vld [vmem:[%s2998_s26 + $0x90] ss:$8 sps:$4 sm:$0xff]  }
  0x72   : > { %v2638_v7 = vld [vmem:[%s2998_s26 + $0x190] ss:$8 sps:$4 sm:$0xff]   ;;  %v2600_v8 = vld [vmem:[%s2998_s26 + $0xa4] ss:$8 sps:$4 sm:$0xff]   ;;  %v2602_v10 = vld [vmem:[%s2998_s26 + $0xa0] ss:$8 sps:$4 sm:$0xff]  }
  0x73   : > { %v2639_v9 = vld [vmem:[%s2998_s26 + $0x1a4] ss:$8 sps:$4 sm:$0xff]   ;;  %v2641_v11 = vld [vmem:[%s2998_s26 + $0x1a0] ss:$8 sps:$4 sm:$0xff]   ;;  %v2606_v12 = vld [vmem:[%s2998_s26 + $0xb4] ss:$8 sps:$4 sm:$0xff]  }
  0x74   : > { %807 = vmatpush1.bf16.msra.mxu0 %v2533_v14  ;;  %2437 = vmatpush1.bf16.msra.mxu1 %v2533_v14  ;;  %v2642_v13 = vld [vmem:[%s2998_s26 + $0x1b4] ss:$8 sps:$4 sm:$0xff]   ;;  %v2608_v14 = vld [vmem:[%s2998_s26 + $0xb0] ss:$8 sps:$4 sm:$0xff]   ;;  %s3084_s18 = scalar_lea.vmem [#allocation7], %s2172_s7  ;;  %s2413_s20 = sshll.u32 %s2868_s16, 13 }
  0x75   : > { %808 = vmatprep.subr.bf16.mxu0 %v2534_v15  ;;  %2422 = vmatprep.subr.bf16.mxu1 %v2534_v15  ;;  %v2644_v15 = vld [vmem:[%s2998_s26 + $0x1b0] ss:$8 sps:$4 sm:$0xff]   ;;  %v2618_v20 = vld [vmem:[%s2998_s26 + $0xd4] ss:$8 sps:$4 sm:$0xff]   ;;  %s2034_s8 = sshll.u32 %s3084_s18, 4  ;;  %s3333_s25 = scalar_lea.hbm %s3608_s2, %s2413_s20  ;;  %s3335_s8 = int_to_ptr.vmem [resolvable:$true] %s2034_s8 }
  0x76   : > { %s2015_s5 = scalar_lea.sflag [#allocation4], %s2992_s6  ;;  %s2715_s11 = scalar_lea.vmem %s3335_s8, 8192 }
  0x77   : > { %p2716_p4 = scmp.ne.s32.totalorder %s3335_s8, %s2715_s11  ;;  %s2823_s27 = smov [#allocation7]  }
  0x78   : > { %809 = vmatpush1.bf16.msra.mxu0 %v2536_v16  ;;  %2438 = vmatpush1.bf16.msra.mxu1 %v2536_v16  ;;  %v2612_v16 = vld [vmem:[%s2998_s26 + $0xc4] ss:$8 sps:$4 sm:$0xff]   ;;  %s2719_s28 = sshll.u32 %s2823_s27, 4  ;;  %s2720_s28 = int_to_ptr.vmem [resolvable:$false] %s2719_s28 }
  0x79   : > { %810 = vmatprep.subr.bf16.mxu0 %v2537_v17  ;;  %2423 = vmatprep.subr.bf16.mxu1 %v2537_v17  ;;  %v2645_v17 = vld [vmem:[%s2998_s26 + $0x1c4] ss:$8 sps:$4 sm:$0xff]   ;;  %p2717_p6 = pnand %p2716_p4, %p2941_p12  ;;  %s2721_s23 = scalar_lea.vmem %s2720_s28, 16384 }
  0x7a   : > { %p2722_p10 = scmp.lt.s32.totalorder %s3335_s8, %s2720_s28  ;;  %p2723_p13 = scmp.lt.s32.totalorder %s2721_s23, %s2715_s11 }
  0x7b   : > { %p2718_p8 = pneg %p2717_p6 }
  0x7c   : > { %811 = vmatpush1.bf16.msra.mxu0 %v2539_v18  ;;  %2439 = vmatpush1.bf16.msra.mxu1 %v2539_v18  ;;  %v2614_v18 = vld [vmem:[%s2998_s26 + $0xc0] ss:$8 sps:$4 sm:$0xff]   ;;  %p2724_p3 = por %p2723_p13, %p2722_p10 }
  0x7d   : > { %812 = vmatprep.subr.bf16.mxu0 %v2540_v19  ;;  %2424 = vmatprep.subr.bf16.mxu1 %v2540_v19  ;;  %v2647_v19 = vld [vmem:[%s2998_s26 + $0x1c0] ss:$8 sps:$4 sm:$0xff]  }
  0x7e   : > { %p2725_p7 = pnand %p2724_p3, %p2718_p8 }
  0x80   : > { %813 = vmatpush1.bf16.msra.mxu0 %v2542_v21  ;;  %2440 = vmatpush1.bf16.msra.mxu1 %v2542_v21  ;;  %v2648_v21 = vld [vmem:[%s2998_s26 + $0x1d4] ss:$8 sps:$4 sm:$0xff]  }
  0x81   : > { %814 = vmatprep.subr.bf16.mxu0 %v2543_v22  ;;  %2425 = vmatprep.subr.bf16.mxu1 %v2543_v22  ;;  %v2620_v22 = vld [vmem:[%s2998_s26 + $0xd0] ss:$8 sps:$4 sm:$0xff]  }
  0x84   : > { %815 = vmatpush1.bf16.msra.mxu0 %v2545_v23  ;;  %2441 = vmatpush1.bf16.msra.mxu1 %v2545_v23  ;;  %v2650_v23 = vld [vmem:[%s2998_s26 + $0x1d0] ss:$8 sps:$4 sm:$0xff]  }
  0x85   : > { %816 = vmatprep.subr.bf16.mxu0 %v2546_v24  ;;  %2426 = vmatprep.subr.bf16.mxu1 %v2546_v24  ;;  %v2624_v24 = vld [vmem:[%s2998_s26 + $0xe4] ss:$8 sps:$4 sm:$0xff]  }
  0x88   : > { %817 = vmatpush1.bf16.msra.mxu0 %v2548_v25  ;;  %2442 = vmatpush1.bf16.msra.mxu1 %v2548_v25  ;;  %v2651_v25 = vld [vmem:[%s2998_s26 + $0x1e4] ss:$8 sps:$4 sm:$0xff]  }
  0x89   : > { %818 = vmatprep.subr.bf16.mxu0 %v2549_v26  ;;  %2427 = vmatprep.subr.bf16.mxu1 %v2549_v26  ;;  %v2626_v26 = vld [vmem:[%s2998_s26 + $0xe0] ss:$8 sps:$4 sm:$0xff]  }
  0x8c   : > { %819 = vmatpush1.bf16.msra.mxu0 %v2551_v27  ;;  %2443 = vmatpush1.bf16.msra.mxu1 %v2551_v27  ;;  %v2653_v27 = vld [vmem:[%s2998_s26 + $0x1e0] ss:$8 sps:$4 sm:$0xff]  }
  0x8d   : > { %820 = vmatprep.subr.bf16.mxu0 %v2552_v28  ;;  %2428 = vmatprep.subr.bf16.mxu1 %v2552_v28  ;;  %v2630_v28 = vld [vmem:[%s2998_s26 + $0xf4] ss:$8 sps:$4 sm:$0xff]  }
  0x90   : > { %821 = vmatpush1.bf16.msra.mxu0 %v2554_v29  ;;  %2444 = vmatpush1.bf16.msra.mxu1 %v2554_v29  ;;  %v2654_v29 = vld [vmem:[%s2998_s26 + $0x1f4] ss:$8 sps:$4 sm:$0xff]  }
  0x91   : > { %822 = vmatprep.subr.bf16.mxu0 %v2555_v30  ;;  %2429 = vmatprep.subr.bf16.mxu1 %v2555_v30  ;;  %v2632_v30 = vld [vmem:[%s2998_s26 + $0xf0] ss:$8 sps:$4 sm:$0xff]  }
  0x94   : > { %823 = vmatpush1.bf16.msra.mxu0 %v2557_v31  ;;  %2445 = vmatpush1.bf16.msra.mxu1 %v2557_v31  ;;  %v2656_v31 = vld [vmem:[%s2998_s26 + $0x1f0] ss:$8 sps:$4 sm:$0xff]  }
  0x95   : > { %824 = vmatprep.subr.bf16.mxu0 %v2558_v32  ;;  %2430 = vmatprep.subr.bf16.mxu1 %v2558_v32 }
  0x98   : > { %825 = vmatpush1.bf16.msra.mxu0 %v2560_v33  ;;  %2446 = vmatpush1.bf16.msra.mxu1 %v2560_v33 }
  0x9b   : > { %827 = vmatmul.mubr.bf16.vlgmr.msra.gmra.mrb[0].mxu0 %v2561_v34  ;;  %987 = vmatmul.mubr.bf16.vlgmr.msra.gmra.mrb[0].mxu1 %v2585_v35 }
  0x9c   : > { %836 = vmatprep.mubr.bf16.mxu0 %v2564_v36  ;;  %996 = vmatprep.mubr.bf16.mxu1 %v2591_v37 }
  0xa3   : > { %837 = vmatmul.mubr.bf16.gmra.mrb[4].mxu0 %v2566_v38  ;;  %997 = vmatmul.mubr.bf16.gmra.mrb[4].mxu1 %v2593_v39 }
  0xa4   : > { %846 = vmatprep.mubr.bf16.mxu0 %v2567_v40  ;;  %1006 = vmatprep.mubr.bf16.mxu1 %v2597_v41 }
  0xab   : > { %847 = vmatmul.mubr.bf16.gmra.mrb[8].mxu0 %v2569_v42  ;;  %1007 = vmatmul.mubr.bf16.gmra.mrb[8].mxu1 %v2599_v43 }
  0xac   : > { %856 = vmatprep.mubr.bf16.mxu0 %v2570_v44  ;;  %1016 = vmatprep.mubr.bf16.mxu1 %v2603_v45 }
  0xb3   : > { %857 = vmatmul.mubr.bf16.gmra.mrb[12].mxu0 %v2572_v46  ;;  %1017 = vmatmul.mubr.bf16.gmra.mrb[12].mxu1 %v2605_v47 }
  0xb4   : > { %866 = vmatprep.mubr.bf16.mxu0 %v2573_v48  ;;  %1026 = vmatprep.mubr.bf16.mxu1 %v2609_v49 }
  0xbb   : > { %867 = vmatmul.mubr.bf16.gmra.mrb[16].mxu0 %v2575_v50  ;;  %1027 = vmatmul.mubr.bf16.gmra.mrb[16].mxu1 %v2611_v51 }
  0xbc   : > { %876 = vmatprep.mubr.bf16.mxu0 %v2576_v52  ;;  %1036 = vmatprep.mubr.bf16.mxu1 %v2615_v53 }
  0xc3   : > { %877 = vmatmul.mubr.bf16.gmra.mrb[20].mxu0 %v2578_v54  ;;  %1037 = vmatmul.mubr.bf16.gmra.mrb[20].mxu1 %v2617_v55 }
  0xc4   : > { %886 = vmatprep.mubr.bf16.mxu0 %v2579_v56  ;;  %1046 = vmatprep.mubr.bf16.mxu1 %v2621_v57 }
  0xcb   : > { %887 = vmatmul.mubr.bf16.gmra.mrb[24].mxu0 %v2581_v58  ;;  %1047 = vmatmul.mubr.bf16.gmra.mrb[24].mxu1 %v2623_v59 }
  0xcc   : > { %896 = vmatprep.mubr.bf16.mxu0 %v2582_v60  ;;  %1056 = vmatprep.mubr.bf16.mxu1 %v2627_v61 }
  0xd3   : > { %897 = vmatmul.mubr.bf16.gmra.mrb[28].mxu0 %v2584_v62  ;;  %1057 = vmatmul.mubr.bf16.gmra.mrb[28].mxu1 %v2629_v63 }
  0xd4   : > { %906 = vmatprep.mubr.bf16.mxu0 %v2588_v0  ;;  %1066 = vmatprep.mubr.bf16.mxu1 %v2633_v1 }
  0xdb   : > { %907 = vmatmul.mubr.bf16.gmra.mrb[32].mxu0 %v2590_v2  ;;  %1067 = vmatmul.mubr.bf16.gmra.mrb[32].mxu1 %v2635_v3 }
  0xdc   : > { %916 = vmatprep.mubr.bf16.mxu0 %v2594_v4  ;;  %1076 = vmatprep.mubr.bf16.mxu1 %v2636_v5 }
  0xe3   : > { %917 = vmatmul.mubr.bf16.gmra.mrb[36].mxu0 %v2596_v6  ;;  %1077 = vmatmul.mubr.bf16.gmra.mrb[36].mxu1 %v2638_v7 }
  0xe4   : > { %926 = vmatprep.mubr.bf16.mxu0 %v2600_v8  ;;  %1086 = vmatprep.mubr.bf16.mxu1 %v2639_v9 }
  0xeb   : > { %927 = vmatmul.mubr.bf16.gmra.mrb[40].mxu0 %v2602_v10  ;;  %1087 = vmatmul.mubr.bf16.gmra.mrb[40].mxu1 %v2641_v11 }
  0xec   : > { %936 = vmatprep.mubr.bf16.mxu0 %v2606_v12  ;;  %1096 = vmatprep.mubr.bf16.mxu1 %v2642_v13 }
  0xf3   : > { %937 = vmatmul.mubr.bf16.gmra.mrb[44].mxu0 %v2608_v14  ;;  %1097 = vmatmul.mubr.bf16.gmra.mrb[44].mxu1 %v2644_v15 }
  0xf4   : > { %946 = vmatprep.mubr.bf16.mxu0 %v2612_v16  ;;  %1106 = vmatprep.mubr.bf16.mxu1 %v2645_v17 }
  0xfb   : > { %947 = vmatmul.mubr.bf16.gmra.mrb[48].mxu0 %v2614_v18  ;;  %1107 = vmatmul.mubr.bf16.gmra.mrb[48].mxu1 %v2647_v19 }
  0xfc   : > { %956 = vmatprep.mubr.bf16.mxu0 %v2618_v20  ;;  %1116 = vmatprep.mubr.bf16.mxu1 %v2648_v21 }
 0x103   : > { %957 = vmatmul.mubr.bf16.gmra.mrb[52].mxu0 %v2620_v22  ;;  %1117 = vmatmul.mubr.bf16.gmra.mrb[52].mxu1 %v2650_v23 }
 0x104   : > { %966 = vmatprep.mubr.bf16.mxu0 %v2624_v24  ;;  %1126 = vmatprep.mubr.bf16.mxu1 %v2651_v25 }
 0x10b   : > { %967 = vmatmul.mubr.bf16.gmra.mrb[56].mxu0 %v2626_v26  ;;  %1127 = vmatmul.mubr.bf16.gmra.mrb[56].mxu1 %v2653_v27 }
 0x10c   : > { %976 = vmatprep.mubr.bf16.mxu0 %v2630_v28  ;;  %1136 = vmatprep.mubr.bf16.mxu1 %v2654_v29 }
 0x113   : > { %977 = vmatmul.mubr.bf16.gmra.mrb[60].mxu0 %v2632_v30  ;;  %1137 = vmatmul.mubr.bf16.gmra.mrb[60].mxu1 %v2656_v31 }
 0x16e   : > { %v828_v32 = vpop.f32.mrb[0].mxu0  ;;  %v3072_v33 = vpop.f32.mrb[0].mxu1 }
 0x16f   : > { %v830_v34 = vpop.f32.mrb[1].mxu0  ;;  %v3074_v35 = vpop.f32.mrb[1].mxu1  ;;  %v1733_v40 = vmul.f32 %v828_v32, %v828_v32 }
 0x170   : > { %v2348_v36 = vpack.c.bf16 %v830_v34, %v828_v32  ;;  %v832_v37 = vpop.f32.mrb[2].mxu0  ;;  %v2380_v38 = vpack.c.bf16 %v3074_v35, %v3072_v33  ;;  %v3078_v39 = vpop.f32.mrb[2].mxu1  ;;  %v1734_v41 = vmul.f32 %v830_v34, %v830_v34 }
 0x171   : > { %v1595_v42 = vadd.f32 %v832_v37, %v828_v32  ;;  %v1735_v43 = vmul.f32 %v832_v37, %v832_v37  ;;  %v834_v44 = vpop.f32.mrb[3].mxu0  ;;  %v3080_v45 = vpop.f32.mrb[3].mxu1 }
 0x172   : > { %1531 = vst [vmem:[%s3084_s18] sm:$0xff] %v2348_v36  ;;  %v2349_v46 = vpack.c.bf16 %v834_v44, %v832_v37  ;;  %v1664_v47 = vadd.f32 %v834_v44, %v830_v34  ;;  %v1736_v48 = vmul.f32 %v834_v44, %v834_v44  ;;  %1563 = vst [vmem:[%s3084_s18 + $0x100] sm:$0xff] %v2380_v38 }
 0x173   : > { %v2381_v49 = vpack.c.bf16 %v3080_v45, %v3078_v39  ;;  %v1861_v50 = vadd.f32 %v1735_v43, %v1733_v40 }
 0x174   : > { %1532 = vst [vmem:[%s3084_s18 + $0x8] sm:$0xff] %v2349_v46  ;;  %v1930_v51 = vadd.f32 %v1736_v48, %v1734_v41 }
 0x175   : > { %1564 = vst [vmem:[%s3084_s18 + $0x108] sm:$0xff] %v2381_v49 }
 0x176   : > { %v838_v52 = vpop.f32.mrb[4].mxu0  ;;  %v3092_v53 = vpop.f32.mrb[4].mxu1 }
 0x177   : > { %v1596_v54 = vadd.f32 %v1595_v42, %v838_v52  ;;  %v1737_v55 = vmul.f32 %v838_v52, %v838_v52  ;;  %v840_v56 = vpop.f32.mrb[5].mxu0  ;;  %v3094_v57 = vpop.f32.mrb[5].mxu1 }
 0x178   : > { %v2350_v58 = vpack.c.bf16 %v840_v56, %v838_v52  ;;  %v1665_v59 = vadd.f32 %v1664_v47, %v840_v56  ;;  %v1738_v60 = vmul.f32 %v840_v56, %v840_v56  ;;  %v842_v61 = vpop.f32.mrb[6].mxu0  ;;  %v2382_v62 = vpack.c.bf16 %v3094_v57, %v3092_v53  ;;  %v3098_v63 = vpop.f32.mrb[6].mxu1 }
 0x179   : > { %v1862_v0 = vadd.f32 %v1861_v50, %v1737_v55  ;;  %v1597_v1 = vadd.f32 %v1596_v54, %v842_v61  ;;  %v1739_v2 = vmul.f32 %v842_v61, %v842_v61  ;;  %v844_v3 = vpop.f32.mrb[7].mxu0  ;;  %v3100_v4 = vpop.f32.mrb[7].mxu1 }
 0x17a   : > { %1533 = vst [vmem:[%s3084_s18 + $0x10] sm:$0xff] %v2350_v58  ;;  %v1931_v5 = vadd.f32 %v1930_v51, %v1738_v60  ;;  %v2351_v6 = vpack.c.bf16 %v844_v3, %v842_v61  ;;  %v1666_v7 = vadd.f32 %v1665_v59, %v844_v3  ;;  %v1740_v8 = vmul.f32 %v844_v3, %v844_v3 }
 0x17b   : > { %1565 = vst [vmem:[%s3084_s18 + $0x110] sm:$0xff] %v2382_v62  ;;  %v1863_v9 = vadd.f32 %v1862_v0, %v1739_v2  ;;  %v2383_v10 = vpack.c.bf16 %v3100_v4, %v3098_v63 }
 0x17c   : > { %1534 = vst [vmem:[%s3084_s18 + $0x18] sm:$0xff] %v2351_v6  ;;  %v1932_v11 = vadd.f32 %v1931_v5, %v1740_v8 }
 0x17d   : > { %1566 = vst [vmem:[%s3084_s18 + $0x118] sm:$0xff] %v2383_v10 }
 0x17e   : > { %v848_v12 = vpop.f32.mrb[8].mxu0  ;;  %v3108_v13 = vpop.f32.mrb[8].mxu1 }
 0x17f   : > { %v1598_v14 = vadd.f32 %v1597_v1, %v848_v12  ;;  %v1741_v15 = vmul.f32 %v848_v12, %v848_v12  ;;  %v850_v16 = vpop.f32.mrb[9].mxu0  ;;  %v3110_v17 = vpop.f32.mrb[9].mxu1 }
 0x180   : > { %v2352_v18 = vpack.c.bf16 %v850_v16, %v848_v12  ;;  %v1667_v19 = vadd.f32 %v1666_v7, %v850_v16  ;;  %v1742_v20 = vmul.f32 %v850_v16, %v850_v16  ;;  %v852_v21 = vpop.f32.mrb[10].mxu0  ;;  %v2384_v22 = vpack.c.bf16 %v3110_v17, %v3108_v13  ;;  %v3114_v23 = vpop.f32.mrb[10].mxu1 }
 0x181   : > { %v1864_v24 = vadd.f32 %v1863_v9, %v1741_v15  ;;  %v1599_v25 = vadd.f32 %v1598_v14, %v852_v21  ;;  %v1743_v26 = vmul.f32 %v852_v21, %v852_v21  ;;  %v854_v27 = vpop.f32.mrb[11].mxu0  ;;  %v3116_v28 = vpop.f32.mrb[11].mxu1 }
 0x182   : > { %1535 = vst [vmem:[%s3084_s18 + $0x20] sm:$0xff] %v2352_v18  ;;  %v1933_v29 = vadd.f32 %v1932_v11, %v1742_v20  ;;  %v2353_v30 = vpack.c.bf16 %v854_v27, %v852_v21  ;;  %v1668_v31 = vadd.f32 %v1667_v19, %v854_v27  ;;  %v1744_v32 = vmul.f32 %v854_v27, %v854_v27 }
 0x183   : > { %1567 = vst [vmem:[%s3084_s18 + $0x120] sm:$0xff] %v2384_v22  ;;  %v1865_v34 = vadd.f32 %v1864_v24, %v1743_v26  ;;  %v2385_v36 = vpack.c.bf16 %v3116_v28, %v3114_v23 }
 0x184   : > { %1536 = vst [vmem:[%s3084_s18 + $0x28] sm:$0xff] %v2353_v30  ;;  %v1934_v37 = vadd.f32 %v1933_v29, %v1744_v32 }
 0x185   : > { %1568 = vst [vmem:[%s3084_s18 + $0x128] sm:$0xff] %v2385_v36 }
 0x186   : > { %v858_v38 = vpop.f32.mrb[12].mxu0  ;;  %v3124_v40 = vpop.f32.mrb[12].mxu1 }
 0x187   : > { %v1600_v41 = vadd.f32 %v1599_v25, %v858_v38  ;;  %v1745_v42 = vmul.f32 %v858_v38, %v858_v38  ;;  %v860_v43 = vpop.f32.mrb[13].mxu0  ;;  %v3126_v44 = vpop.f32.mrb[13].mxu1 }
 0x188   : > { %v2354_v46 = vpack.c.bf16 %v860_v43, %v858_v38  ;;  %v1669_v47 = vadd.f32 %v1668_v31, %v860_v43  ;;  %v1746_v48 = vmul.f32 %v860_v43, %v860_v43  ;;  %v862_v49 = vpop.f32.mrb[14].mxu0  ;;  %v2386_v50 = vpack.c.bf16 %v3126_v44, %v3124_v40  ;;  %v3130_v51 = vpop.f32.mrb[14].mxu1 }
 0x189   : > { %v1866_v52 = vadd.f32 %v1865_v34, %v1745_v42  ;;  %v1601_v54 = vadd.f32 %v1600_v41, %v862_v49  ;;  %v1747_v55 = vmul.f32 %v862_v49, %v862_v49  ;;  %v864_v56 = vpop.f32.mrb[15].mxu0  ;;  %v3132_v58 = vpop.f32.mrb[15].mxu1 }
 0x18a   : > { %1537 = vst [vmem:[%s3084_s18 + $0x30] sm:$0xff] %v2354_v46  ;;  %v1935_v59 = vadd.f32 %v1934_v37, %v1746_v48  ;;  %v2355_v60 = vpack.c.bf16 %v864_v56, %v862_v49  ;;  %v1670_v61 = vadd.f32 %v1669_v47, %v864_v56  ;;  %v1748_v62 = vmul.f32 %v864_v56, %v864_v56 }
 0x18b   : > { %1569 = vst [vmem:[%s3084_s18 + $0x130] sm:$0xff] %v2386_v50  ;;  %v1867_v0 = vadd.f32 %v1866_v52, %v1747_v55  ;;  %v2387_v1 = vpack.c.bf16 %v3132_v58, %v3130_v51 }
 0x18c   : > { %1538 = vst [vmem:[%s3084_s18 + $0x38] sm:$0xff] %v2355_v60  ;;  %v1936_v2 = vadd.f32 %v1935_v59, %v1748_v62 }
 0x18d   : > { %1570 = vst [vmem:[%s3084_s18 + $0x138] sm:$0xff] %v2387_v1 }
 0x18e   : > { %v868_v3 = vpop.f32.mrb[16].mxu0  ;;  %v3140_v5 = vpop.f32.mrb[16].mxu1 }
 0x18f   : > { %v1602_v6 = vadd.f32 %v1601_v54, %v868_v3  ;;  %v1749_v7 = vmul.f32 %v868_v3, %v868_v3  ;;  %v870_v8 = vpop.f32.mrb[17].mxu0  ;;  %v3142_v9 = vpop.f32.mrb[17].mxu1 }
 0x190   : > { %v2356_v10 = vpack.c.bf16 %v870_v8, %v868_v3  ;;  %v1671_v11 = vadd.f32 %v1670_v61, %v870_v8  ;;  %v1750_v12 = vmul.f32 %v870_v8, %v870_v8  ;;  %v872_v14 = vpop.f32.mrb[18].mxu0  ;;  %v2388_v15 = vpack.c.bf16 %v3142_v9, %v3140_v5  ;;  %v3146_v16 = vpop.f32.mrb[18].mxu1 }
 0x191   : > { %v1868_v18 = vadd.f32 %v1867_v0, %v1749_v7  ;;  %v1603_v19 = vadd.f32 %v1602_v6, %v872_v14  ;;  %v1751_v20 = vmul.f32 %v872_v14, %v872_v14  ;;  %v874_v21 = vpop.f32.mrb[19].mxu0  ;;  %v3148_v22 = vpop.f32.mrb[19].mxu1 }
 0x192   : > { %1539 = vst [vmem:[%s3084_s18 + $0x40] sm:$0xff] %v2356_v10  ;;  %v1937_v24 = vadd.f32 %v1936_v2, %v1750_v12  ;;  %v2357_v25 = vpack.c.bf16 %v874_v21, %v872_v14  ;;  %v1672_v26 = vadd.f32 %v1671_v11, %v874_v21  ;;  %v1752_v27 = vmul.f32 %v874_v21, %v874_v21 }
 0x193   : > { %1571 = vst [vmem:[%s3084_s18 + $0x140] sm:$0xff] %v2388_v15  ;;  %v1869_v29 = vadd.f32 %v1868_v18, %v1751_v20  ;;  %v2389_v30 = vpack.c.bf16 %v3148_v22, %v3146_v16 }
 0x194   : > { %1540 = vst [vmem:[%s3084_s18 + $0x48] sm:$0xff] %v2357_v25  ;;  %v1938_v31 = vadd.f32 %v1937_v24, %v1752_v27 }
 0x195   : > { %1572 = vst [vmem:[%s3084_s18 + $0x148] sm:$0xff] %v2389_v30 }
 0x196   : > { %v878_v32 = vpop.f32.mrb[20].mxu0  ;;  %v3156_v34 = vpop.f32.mrb[20].mxu1 }
 0x197   : > { %v1604_v36 = vadd.f32 %v1603_v19, %v878_v32  ;;  %v1753_v37 = vmul.f32 %v878_v32, %v878_v32  ;;  %v880_v38 = vpop.f32.mrb[21].mxu0  ;;  %v3158_v41 = vpop.f32.mrb[21].mxu1 }
 0x198   : > { %v2358_v42 = vpack.c.bf16 %v880_v38, %v878_v32  ;;  %v1673_v43 = vadd.f32 %v1672_v26, %v880_v38  ;;  %v1754_v46 = vmul.f32 %v880_v38, %v880_v38  ;;  %v882_v47 = vpop.f32.mrb[22].mxu0  ;;  %v2390_v48 = vpack.c.bf16 %v3158_v41, %v3156_v34  ;;  %v3162_v49 = vpop.f32.mrb[22].mxu1 }
 0x199   : > { %v1870_v50 = vadd.f32 %v1869_v29, %v1753_v37  ;;  %v1605_v52 = vadd.f32 %v1604_v36, %v882_v47  ;;  %v1755_v54 = vmul.f32 %v882_v47, %v882_v47  ;;  %v884_v55 = vpop.f32.mrb[23].mxu0  ;;  %v3164_v56 = vpop.f32.mrb[23].mxu1 }
 0x19a   : > { %1541 = vst [vmem:[%s3084_s18 + $0x50] sm:$0xff] %v2358_v42  ;;  %v1939_v59 = vadd.f32 %v1938_v31, %v1754_v46  ;;  %v2359_v60 = vpack.c.bf16 %v884_v55, %v882_v47  ;;  %v1674_v61 = vadd.f32 %v1673_v43, %v884_v55  ;;  %v1756_v62 = vmul.f32 %v884_v55, %v884_v55 }
 0x19b   : > { %1573 = vst [vmem:[%s3084_s18 + $0x150] sm:$0xff] %v2390_v48  ;;  %v1871_v0 = vadd.f32 %v1870_v50, %v1755_v54  ;;  %v2391_v1 = vpack.c.bf16 %v3164_v56, %v3162_v49 }
 0x19c   : > { %1542 = vst [vmem:[%s3084_s18 + $0x58] sm:$0xff] %v2359_v60  ;;  %v1940_v2 = vadd.f32 %v1939_v59, %v1756_v62 }
 0x19d   : > { %1574 = vst [vmem:[%s3084_s18 + $0x158] sm:$0xff] %v2391_v1 }
 0x19e   : > { %v888_v3 = vpop.f32.mrb[24].mxu0  ;;  %v3172_v6 = vpop.f32.mrb[24].mxu1 }
 0x19f   : > { %v1606_v7 = vadd.f32 %v1605_v52, %v888_v3  ;;  %v1757_v8 = vmul.f32 %v888_v3, %v888_v3  ;;  %v890_v10 = vpop.f32.mrb[25].mxu0  ;;  %v3174_v11 = vpop.f32.mrb[25].mxu1 }
 0x1a0   : > { %v2360_v12 = vpack.c.bf16 %v890_v10, %v888_v3  ;;  %v1675_v14 = vadd.f32 %v1674_v61, %v890_v10  ;;  %v1758_v15 = vmul.f32 %v890_v10, %v890_v10  ;;  %v892_v18 = vpop.f32.mrb[26].mxu0  ;;  %v2392_v19 = vpack.c.bf16 %v3174_v11, %v3172_v6  ;;  %v3178_v20 = vpop.f32.mrb[26].mxu1 }
 0x1a1   : > { %v1872_v21 = vadd.f32 %v1871_v0, %v1757_v8  ;;  %v1607_v24 = vadd.f32 %v1606_v7, %v892_v18  ;;  %v1759_v25 = vmul.f32 %v892_v18, %v892_v18  ;;  %v894_v26 = vpop.f32.mrb[27].mxu0  ;;  %v3180_v27 = vpop.f32.mrb[27].mxu1 }
 0x1a2   : > { %1543 = vst [vmem:[%s3084_s18 + $0x60] sm:$0xff] %v2360_v12  ;;  %v1941_v29 = vadd.f32 %v1940_v2, %v1758_v15  ;;  %v2361_v30 = vpack.c.bf16 %v894_v26, %v892_v18  ;;  %v1676_v31 = vadd.f32 %v1675_v14, %v894_v26  ;;  %v1760_v32 = vmul.f32 %v894_v26, %v894_v26 }
 0x1a3   : > { %1575 = vst [vmem:[%s3084_s18 + $0x160] sm:$0xff] %v2392_v19  ;;  %v1873_v36 = vadd.f32 %v1872_v21, %v1759_v25  ;;  %v2393_v37 = vpack.c.bf16 %v3180_v27, %v3178_v20 }
 0x1a4   : > { %1544 = vst [vmem:[%s3084_s18 + $0x68] sm:$0xff] %v2361_v30  ;;  %v1942_v38 = vadd.f32 %v1941_v29, %v1760_v32 }
 0x1a5   : > { %1576 = vst [vmem:[%s3084_s18 + $0x168] sm:$0xff] %v2393_v37 }
 0x1a6   : > { %v898_v42 = vpop.f32.mrb[28].mxu0  ;;  %v3188_v43 = vpop.f32.mrb[28].mxu1 }
 0x1a7   : > { %v1608_v46 = vadd.f32 %v1607_v24, %v898_v42  ;;  %v1761_v47 = vmul.f32 %v898_v42, %v898_v42  ;;  %v900_v48 = vpop.f32.mrb[29].mxu0  ;;  %v3190_v50 = vpop.f32.mrb[29].mxu1 }
 0x1a8   : > { %v2362_v52 = vpack.c.bf16 %v900_v48, %v898_v42  ;;  %v1677_v54 = vadd.f32 %v1676_v31, %v900_v48  ;;  %v1762_v55 = vmul.f32 %v900_v48, %v900_v48  ;;  %v902_v59 = vpop.f32.mrb[30].mxu0  ;;  %v2394_v60 = vpack.c.bf16 %v3190_v50, %v3188_v43  ;;  %v3194_v61 = vpop.f32.mrb[30].mxu1 }
 0x1a9   : > { %v1874_v62 = vadd.f32 %v1873_v36, %v1761_v47  ;;  %v1609_v0 = vadd.f32 %v1608_v46, %v902_v59  ;;  %v1763_v1 = vmul.f32 %v902_v59, %v902_v59  ;;  %v904_v2 = vpop.f32.mrb[31].mxu0  ;;  %v3196_v3 = vpop.f32.mrb[31].mxu1 }
 0x1aa   : > { %1545 = vst [vmem:[%s3084_s18 + $0x70] sm:$0xff] %v2362_v52  ;;  %v1943_v7 = vadd.f32 %v1942_v38, %v1762_v55  ;;  %v2363_v8 = vpack.c.bf16 %v904_v2, %v902_v59  ;;  %v1678_v10 = vadd.f32 %v1677_v54, %v904_v2  ;;  %v1764_v12 = vmul.f32 %v904_v2, %v904_v2 }
 0x1ab   : > { %1577 = vst [vmem:[%s3084_s18 + $0x170] sm:$0xff] %v2394_v60  ;;  %v1875_v14 = vadd.f32 %v1874_v62, %v1763_v1  ;;  %v2395_v15 = vpack.c.bf16 %v3196_v3, %v3194_v61 }
 0x1ac   : > { %1546 = vst [vmem:[%s3084_s18 + $0x78] sm:$0xff] %v2363_v8  ;;  %v1944_v18 = vadd.f32 %v1943_v7, %v1764_v12 }
 0x1ad   : > { %1578 = vst [vmem:[%s3084_s18 + $0x178] sm:$0xff] %v2395_v15 }
 0x1ae   : > { %v908_v19 = vpop.f32.mrb[32].mxu0  ;;  %v3204_v21 = vpop.f32.mrb[32].mxu1 }
 0x1af   : > { %v1610_v24 = vadd.f32 %v1609_v0, %v908_v19  ;;  %v1765_v25 = vmul.f32 %v908_v19, %v908_v19  ;;  %v910_v26 = vpop.f32.mrb[33].mxu0  ;;  %v3206_v29 = vpop.f32.mrb[33].mxu1 }
 0x1b0   : > { %v2364_v30 = vpack.c.bf16 %v910_v26, %v908_v19  ;;  %v1679_v31 = vadd.f32 %v1678_v10, %v910_v26  ;;  %v1766_v32 = vmul.f32 %v910_v26, %v910_v26  ;;  %v912_v36 = vpop.f32.mrb[34].mxu0  ;;  %v2396_v37 = vpack.c.bf16 %v3206_v29, %v3204_v21  ;;  %v3210_v38 = vpop.f32.mrb[34].mxu1 }
 0x1b1   : > { %v1876_v42 = vadd.f32 %v1875_v14, %v1765_v25  ;;  %v1611_v46 = vadd.f32 %v1610_v24, %v912_v36  ;;  %v1767_v47 = vmul.f32 %v912_v36, %v912_v36  ;;  %v914_v48 = vpop.f32.mrb[35].mxu0  ;;  %v3212_v52 = vpop.f32.mrb[35].mxu1 }
 0x1b2   : > { %1547 = vst [vmem:[%s3084_s18 + $0x80] sm:$0xff] %v2364_v30  ;;  %v1945_v54 = vadd.f32 %v1944_v18, %v1766_v32  ;;  %v2365_v55 = vpack.c.bf16 %v914_v48, %v912_v36  ;;  %v1680_v59 = vadd.f32 %v1679_v31, %v914_v48  ;;  %v1768_v60 = vmul.f32 %v914_v48, %v914_v48 }
 0x1b3   : > { %1579 = vst [vmem:[%s3084_s18 + $0x180] sm:$0xff] %v2396_v37  ;;  %v1877_v62 = vadd.f32 %v1876_v42, %v1767_v47  ;;  %v2397_v0 = vpack.c.bf16 %v3212_v52, %v3210_v38 }
 0x1b4   : > { %1548 = vst [vmem:[%s3084_s18 + $0x88] sm:$0xff] %v2365_v55  ;;  %v1946_v1 = vadd.f32 %v1945_v54, %v1768_v60 }
 0x1b5   : > { %1580 = vst [vmem:[%s3084_s18 + $0x188] sm:$0xff] %v2397_v0 }
 0x1b6   : > { %v918_v2 = vpop.f32.mrb[36].mxu0  ;;  %v3220_v7 = vpop.f32.mrb[36].mxu1 }
 0x1b7   : > { %v1612_v8 = vadd.f32 %v1611_v46, %v918_v2  ;;  %v1769_v10 = vmul.f32 %v918_v2, %v918_v2  ;;  %v920_v12 = vpop.f32.mrb[37].mxu0  ;;  %v3222_v14 = vpop.f32.mrb[37].mxu1 }
 0x1b8   : > { %v2366_v15 = vpack.c.bf16 %v920_v12, %v918_v2  ;;  %v1681_v18 = vadd.f32 %v1680_v59, %v920_v12  ;;  %v1770_v19 = vmul.f32 %v920_v12, %v920_v12  ;;  %v922_v24 = vpop.f32.mrb[38].mxu0  ;;  %v2398_v25 = vpack.c.bf16 %v3222_v14, %v3220_v7  ;;  %v3226_v26 = vpop.f32.mrb[38].mxu1 }
 0x1b9   : > { %v1878_v30 = vadd.f32 %v1877_v62, %v1769_v10  ;;  %v1613_v31 = vadd.f32 %v1612_v8, %v922_v24  ;;  %v1771_v32 = vmul.f32 %v922_v24, %v922_v24  ;;  %v924_v36 = vpop.f32.mrb[39].mxu0  ;;  %v3228_v37 = vpop.f32.mrb[39].mxu1 }
 0x1ba   : > { %1549 = vst [vmem:[%s3084_s18 + $0x90] sm:$0xff] %v2366_v15  ;;  %v1947_v42 = vadd.f32 %v1946_v1, %v1770_v19  ;;  %v2367_v46 = vpack.c.bf16 %v924_v36, %v922_v24  ;;  %v1682_v47 = vadd.f32 %v1681_v18, %v924_v36  ;;  %v1772_v48 = vmul.f32 %v924_v36, %v924_v36 }
 0x1bb   : > { %1581 = vst [vmem:[%s3084_s18 + $0x190] sm:$0xff] %v2398_v25  ;;  %v1879_v54 = vadd.f32 %v1878_v30, %v1771_v32  ;;  %v2399_v55 = vpack.c.bf16 %v3228_v37, %v3226_v26 }
 0x1bc   : > { %1550 = vst [vmem:[%s3084_s18 + $0x98] sm:$0xff] %v2367_v46  ;;  %v1948_v59 = vadd.f32 %v1947_v42, %v1772_v48 }
 0x1bd   : > { %1582 = vst [vmem:[%s3084_s18 + $0x198] sm:$0xff] %v2399_v55 }
 0x1be   : > { %v928_v60 = vpop.f32.mrb[40].mxu0  ;;  %v3236_v62 = vpop.f32.mrb[40].mxu1 }
 0x1bf   : > { %3660 = vst [vmem:[#allocation14_spill] sm:$0xff] %v3236_v62  ;;  %v1614_v0 = vadd.f32 %v1613_v31, %v928_v60  ;;  %v1773_v2 = vmul.f32 %v928_v60, %v928_v60  ;;  %v930_v8 = vpop.f32.mrb[41].mxu0  ;;  %v3238_v10 = vpop.f32.mrb[41].mxu1 }
 0x1c0   : > { %3661 = vst [vmem:[#allocation15_spill] sm:$0xff] %v3238_v10  ;;  %v2368_v1 = vpack.c.bf16 %v930_v8, %v928_v60  ;;  %v1683_v12 = vadd.f32 %v1682_v47, %v930_v8  ;;  %v1774_v15 = vmul.f32 %v930_v8, %v930_v8  ;;  %v932_v18 = vpop.f32.mrb[42].mxu0  ;;  %v2400_v19 = vpack.c.bf16 %v3238_v10, %v3236_v62  ;;  %v3242_v24 = vpop.f32.mrb[42].mxu1 }
 0x1c1   : > { %3662 = vst [vmem:[#allocation16_spill] sm:$0xff] %v3242_v24  ;;  %v1880_v25 = vadd.f32 %v1879_v54, %v1773_v2  ;;  %v1615_v30 = vadd.f32 %v1614_v0, %v932_v18  ;;  %v1775_v32 = vmul.f32 %v932_v18, %v932_v18  ;;  %v934_v31 = vpop.f32.mrb[43].mxu0  ;;  %v3244_v36 = vpop.f32.mrb[43].mxu1 }
 0x1c2   : > { %3663 = vst [vmem:[#allocation17_spill] sm:$0xff] %v3244_v36  ;;  %1551 = vst [vmem:[%s3084_s18 + $0xa0] sm:$0xff] %v2368_v1  ;;  %v1949_v42 = vadd.f32 %v1948_v59, %v1774_v15  ;;  %v2369_v46 = vpack.c.bf16 %v934_v31, %v932_v18  ;;  %v1684_v48 = vadd.f32 %v1683_v12, %v934_v31 }
 0x1c3   : > { %v1776_v47 = vmul.f32 %v934_v31, %v934_v31  ;;  %1583 = vst [vmem:[%s3084_s18 + $0x1a0] sm:$0xff] %v2400_v19  ;;  %v1881_v55 = vadd.f32 %v1880_v25, %v1775_v32  ;;  %v2401_v60 = vpack.c.bf16 %v3244_v36, %v3242_v24 }
 0x1c4   : > { %1552 = vst [vmem:[%s3084_s18 + $0xa8] sm:$0xff] %v2369_v46 }
 0x1c5   : > { %v1950_v8 = vadd.f32 %v1949_v42, %v1776_v47  ;;  %1584 = vst [vmem:[%s3084_s18 + $0x1a8] sm:$0xff] %v2401_v60 }
 0x1c6   : > { %v938_v10 = vpop.f32.mrb[44].mxu0  ;;  %v3252_v54 = vpop.f32.mrb[44].mxu1 }
 0x1c7   : > { %3664 = vst [vmem:[#allocation18_spill] sm:$0xff] %v3252_v54  ;;  %v1616_v0 = vadd.f32 %v1615_v30, %v938_v10  ;;  %v1777_v2 = vmul.f32 %v938_v10, %v938_v10  ;;  %v940_v62 = vpop.f32.mrb[45].mxu0  ;;  %v3254_v1 = vpop.f32.mrb[45].mxu1 }
 0x1c8   : > { %3665 = vst [vmem:[#allocation19_spill] sm:$0xff] %v3254_v1  ;;  %v2370_v59 = vpack.c.bf16 %v940_v62, %v938_v10  ;;  %v1685_v12 = vadd.f32 %v1684_v48, %v940_v62  ;;  %v1778_v15 = vmul.f32 %v940_v62, %v940_v62  ;;  %v942_v18 = vpop.f32.mrb[46].mxu0  ;;  %v2402_v19 = vpack.c.bf16 %v3254_v1, %v3252_v54  ;;  %v3258_v25 = vpop.f32.mrb[46].mxu1 }
 0x1c9   : > { %3666 = vst [vmem:[#allocation20_spill] sm:$0xff] %v3258_v25  ;;  %v1882_v32 = vadd.f32 %v1881_v55, %v1777_v2  ;;  %v1617_v31 = vadd.f32 %v1616_v0, %v942_v18  ;;  %v1779_v42 = vmul.f32 %v942_v18, %v942_v18  ;;  %v944_v30 = vpop.f32.mrb[47].mxu0  ;;  %v3260_v46 = vpop.f32.mrb[47].mxu1 }
 0x1ca   : > { %3667 = vst [vmem:[#allocation21_spill] sm:$0xff] %v3260_v46  ;;  %1553 = vst [vmem:[%s3084_s18 + $0xb0] sm:$0xff] %v2370_v59  ;;  %v1951_v47 = vadd.f32 %v1950_v8, %v1778_v15  ;;  %v2371_v10 = vpack.c.bf16 %v944_v30, %v942_v18  ;;  %v1686_v60 = vadd.f32 %v1685_v12, %v944_v30 }
 0x1cb   : > { %v1780_v48 = vmul.f32 %v944_v30, %v944_v30  ;;  %1585 = vst [vmem:[%s3084_s18 + $0x1b0] sm:$0xff] %v2402_v19  ;;  %v1883_v62 = vadd.f32 %v1882_v32, %v1779_v42  ;;  %v2403_v36 = vpack.c.bf16 %v3260_v46, %v3258_v25 }
 0x1cc   : > { %1554 = vst [vmem:[%s3084_s18 + $0xb8] sm:$0xff] %v2371_v10 }
 0x1cd   : > { %v1952_v1 = vadd.f32 %v1951_v47, %v1780_v48  ;;  %1586 = vst [vmem:[%s3084_s18 + $0x1b8] sm:$0xff] %v2403_v36 }
 0x1ce   : > { %v948_v54 = vpop.f32.mrb[48].mxu0  ;;  %v3268_v55 = vpop.f32.mrb[48].mxu1 }
 0x1cf   : > { %3668 = vst [vmem:[#allocation22_spill] sm:$0xff] %v3268_v55  ;;  %v1618_v0 = vadd.f32 %v1617_v31, %v948_v54  ;;  %v1781_v2 = vmul.f32 %v948_v54, %v948_v54  ;;  %v950_v24 = vpop.f32.mrb[49].mxu0  ;;  %v3270_v59 = vpop.f32.mrb[49].mxu1 }
 0x1d0   : > { %3669 = vst [vmem:[#allocation23_spill] sm:$0xff] %v3270_v59  ;;  %v2372_v8 = vpack.c.bf16 %v950_v24, %v948_v54  ;;  %v1687_v12 = vadd.f32 %v1686_v60, %v950_v24  ;;  %v1782_v15 = vmul.f32 %v950_v24, %v950_v24  ;;  %v952_v18 = vpop.f32.mrb[50].mxu0  ;;  %v2404_v19 = vpack.c.bf16 %v3270_v59, %v3268_v55  ;;  %v3274_v32 = vpop.f32.mrb[50].mxu1 }
 0x1d1   : > { %3670 = vst [vmem:[#allocation24_spill] sm:$0xff] %v3274_v32  ;;  %v1884_v36 = vadd.f32 %v1883_v62, %v1781_v2  ;;  %v1619_v42 = vadd.f32 %v1618_v0, %v952_v18  ;;  %v1783_v30 = vmul.f32 %v952_v18, %v952_v18  ;;  %v954_v31 = vpop.f32.mrb[51].mxu0  ;;  %v3276_v47 = vpop.f32.mrb[51].mxu1 }
 0x1d2   : > { %3671 = vst [vmem:[#allocation25_spill] sm:$0xff] %v3276_v47  ;;  %1555 = vst [vmem:[%s3084_s18 + $0xc0] sm:$0xff] %v2372_v8  ;;  %v1953_v10 = vadd.f32 %v1952_v1, %v1782_v15  ;;  %v2373_v54 = vpack.c.bf16 %v954_v31, %v952_v18  ;;  %v1688_v48 = vadd.f32 %v1687_v12, %v954_v31 }
 0x1d3   : > { %v1784_v60 = vmul.f32 %v954_v31, %v954_v31  ;;  %1587 = vst [vmem:[%s3084_s18 + $0x1c0] sm:$0xff] %v2404_v19  ;;  %v1885_v24 = vadd.f32 %v1884_v36, %v1783_v30  ;;  %v2405_v46 = vpack.c.bf16 %v3276_v47, %v3274_v32 }
 0x1d4   : > { %1556 = vst [vmem:[%s3084_s18 + $0xc8] sm:$0xff] %v2373_v54 }
 0x1d5   : > { %v1954_v59 = vadd.f32 %v1953_v10, %v1784_v60  ;;  %1588 = vst [vmem:[%s3084_s18 + $0x1c8] sm:$0xff] %v2405_v46 }
 0x1d6   : > { %v958_v55 = vpop.f32.mrb[52].mxu0  ;;  %v3284_v62 = vpop.f32.mrb[52].mxu1 }
 0x1d7   : > { %3672 = vst [vmem:[#allocation26_spill] sm:$0xff] %v3284_v62  ;;  %v1620_v0 = vadd.f32 %v1619_v42, %v958_v55  ;;  %v1785_v2 = vmul.f32 %v958_v55, %v958_v55  ;;  %v960_v25 = vpop.f32.mrb[53].mxu0  ;;  %v3286_v8 = vpop.f32.mrb[53].mxu1 }
 0x1d8   : > { %3673 = vst [vmem:[#allocation27_spill] sm:$0xff] %v3286_v8  ;;  %v2374_v1 = vpack.c.bf16 %v960_v25, %v958_v55  ;;  %v1689_v12 = vadd.f32 %v1688_v48, %v960_v25  ;;  %v1786_v15 = vmul.f32 %v960_v25, %v960_v25  ;;  %v962_v18 = vpop.f32.mrb[54].mxu0  ;;  %v2406_v19 = vpack.c.bf16 %v3286_v8, %v3284_v62  ;;  %v3290_v36 = vpop.f32.mrb[54].mxu1 }
 0x1d9   : > { %v1886_v46 = vadd.f32 %v1885_v24, %v1785_v2  ;;  %v1621_v30 = vadd.f32 %v1620_v0, %v962_v18  ;;  %v1787_v31 = vmul.f32 %v962_v18, %v962_v18  ;;  %v964_v42 = vpop.f32.mrb[55].mxu0  ;;  %v3292_v10 = vpop.f32.mrb[55].mxu1 }
 0x1da   : > { %3674 = vst [vmem:[#allocation28_spill] sm:$0xff] %v3292_v10  ;;  %1557 = vst [vmem:[%s3084_s18 + $0xd0] sm:$0xff] %v2374_v1  ;;  %v1955_v54 = vadd.f32 %v1954_v59, %v1786_v15  ;;  %v2375_v55 = vpack.c.bf16 %v964_v42, %v962_v18  ;;  %v1690_v60 = vadd.f32 %v1689_v12, %v964_v42 }
 0x1db   : > { %v1788_v48 = vmul.f32 %v964_v42, %v964_v42  ;;  %1589 = vst [vmem:[%s3084_s18 + $0x1d0] sm:$0xff] %v2406_v19  ;;  %v1887_v25 = vadd.f32 %v1886_v46, %v1787_v31  ;;  %v2407_v47 = vpack.c.bf16 %v3292_v10, %v3290_v36 }
 0x1dc   : > { %1558 = vst [vmem:[%s3084_s18 + $0xd8] sm:$0xff] %v2375_v55 }
 0x1dd   : > { %v1956_v8 = vadd.f32 %v1955_v54, %v1788_v48  ;;  %1590 = vst [vmem:[%s3084_s18 + $0x1d8] sm:$0xff] %v2407_v47 }
 0x1de   : > { %v968_v62 = vpop.f32.mrb[56].mxu0  ;;  %v3300_v24 = vpop.f32.mrb[56].mxu1 }
 0x1df   : > { %3675 = vst [vmem:[#allocation29_spill] sm:$0xff] %v3300_v24  ;;  %v1622_v0 = vadd.f32 %v1621_v30, %v968_v62  ;;  %v1789_v2 = vmul.f32 %v968_v62, %v968_v62  ;;  %v970_v32 = vpop.f32.mrb[57].mxu0  ;;  %v3302_v1 = vpop.f32.mrb[57].mxu1 }
 0x1e0   : > { %3676 = vst [vmem:[#allocation30_spill] sm:$0xff] %v3302_v1  ;;  %v2376_v59 = vpack.c.bf16 %v970_v32, %v968_v62  ;;  %v1691_v12 = vadd.f32 %v1690_v60, %v970_v32  ;;  %v1790_v15 = vmul.f32 %v970_v32, %v970_v32  ;;  %v972_v18 = vpop.f32.mrb[58].mxu0  ;;  %v2408_v19 = vpack.c.bf16 %v3302_v1, %v3300_v24  ;;  %v3306_v46 = vpop.f32.mrb[58].mxu1 }
 0x1e1   : > { %v1888_v47 = vadd.f32 %v1887_v25, %v1789_v2  ;;  %v1623_v31 = vadd.f32 %v1622_v0, %v972_v18  ;;  %v1791_v42 = vmul.f32 %v972_v18, %v972_v18  ;;  %v974_v30 = vpop.f32.mrb[59].mxu0  ;;  %v3308_v54 = vpop.f32.mrb[59].mxu1 }
 0x1e2   : > { %3677 = vst [vmem:[#allocation31_spill] sm:$0xff] %v3308_v54  ;;  %1559 = vst [vmem:[%s3084_s18 + $0xe0] sm:$0xff] %v2376_v59  ;;  %v1957_v55 = vadd.f32 %v1956_v8, %v1790_v15  ;;  %v2377_v62 = vpack.c.bf16 %v974_v30, %v972_v18  ;;  %v1692_v32 = vadd.f32 %v1691_v12, %v974_v30 }
 0x1e3   : > { %v1792_v60 = vmul.f32 %v974_v30, %v974_v30  ;;  %1591 = vst [vmem:[%s3084_s18 + $0x1e0] sm:$0xff] %v2408_v19  ;;  %v1889_v48 = vadd.f32 %v1888_v47, %v1791_v42  ;;  %v2409_v1 = vpack.c.bf16 %v3308_v54, %v3306_v46 }
 0x1e4   : > { %1560 = vst [vmem:[%s3084_s18 + $0xe8] sm:$0xff] %v2377_v62 }
 0x1e5   : > { %v1958_v24 = vadd.f32 %v1957_v55, %v1792_v60  ;;  %1592 = vst [vmem:[%s3084_s18 + $0x1e8] sm:$0xff] %v2409_v1 }
 0x1e6   : > { %v978_v25 = vpop.f32.mrb[60].mxu0  ;;  %v3316_v0 = vpop.f32.mrb[60].mxu1 }
 0x1e7   : > { %v1624_v2 = vadd.f32 %v1623_v31, %v978_v25  ;;  %v1793_v10 = vmul.f32 %v978_v25, %v978_v25  ;;  %v980_v8 = vpop.f32.mrb[61].mxu0  ;;  %v3318_v59 = vpop.f32.mrb[61].mxu1 }
 0x1e8   : > { %v2378_v12 = vpack.c.bf16 %v980_v8, %v978_v25  ;;  %v1693_v15 = vadd.f32 %v1692_v32, %v980_v8  ;;  %v1794_v18 = vmul.f32 %v980_v8, %v980_v8  ;;  %v982_v19 = vpop.f32.mrb[62].mxu0  ;;  %v2410_v47 = vpack.c.bf16 %v3318_v59, %v3316_v0  ;;  %v3324_v1 = vpop.f32.mrb[62].mxu1 }
 0x1e9   : > { %v1890_v42 = vadd.f32 %v1889_v48, %v1793_v10  ;;  %v1625_v30 = vadd.f32 %v1624_v2, %v982_v19  ;;  %v1795_v31 = vmul.f32 %v982_v19, %v982_v19  ;;  %v984_v55 = vpop.f32.mrb[63].mxu0  ;;  %v3326_v62 = vpop.f32.mrb[63].mxu1  ;;  %v1797_v10 = vmul.f32 %v3072_v33, %v3072_v33 }
 0x1ea   : > { %1561 = vst [vmem:[%s3084_s18 + $0xf0] sm:$0xff] %v2378_v12  ;;  %v1959_v60 = vadd.f32 %v1958_v24, %v1794_v18  ;;  %v2379_v54 = vpack.c.bf16 %v984_v55, %v982_v19  ;;  %v1694_v25 = vadd.f32 %v1693_v15, %v984_v55  ;;  %v1796_v32 = vmul.f32 %v984_v55, %v984_v55 }
 0x1eb   : > { %1593 = vst [vmem:[%s3084_s18 + $0x1f0] sm:$0xff] %v2410_v47  ;;  %v1626_v48 = vadd.f32 %v1625_v30, %v3072_v33  ;;  %v1891_v24 = vadd.f32 %v1890_v42, %v1795_v31  ;;  %v2411_v2 = vpack.c.bf16 %v3326_v62, %v3324_v1  ;;  %v1798_v8 = vmul.f32 %v3074_v35, %v3074_v35 }
 0x1ec   : > { %1562 = vst [vmem:[%s3084_s18 + $0xf8] sm:$0xff] %v2379_v54  ;;  %v1695_v12 = vadd.f32 %v1694_v25, %v3074_v35  ;;  %v1960_v15 = vadd.f32 %v1959_v60, %v1796_v32  ;;  %v1799_v18 = vmul.f32 %v3078_v39, %v3078_v39  ;;  %v1800_v47 = vmul.f32 %v3080_v45, %v3080_v45 }
 0x1ed   : > { %v1627_v19 = vadd.f32 %v1626_v48, %v3078_v39  ;;  %v1892_v33 = vadd.f32 %v1891_v24, %v1797_v10  ;;  %1594 = vst [vmem:[%s3084_s18 + $0x1f8] sm:$0xff] %v2411_v2 }
 0x1ee   : > { %v1696_v42 = vadd.f32 %v1695_v12, %v3080_v45  ;;  %v1961_v30 = vadd.f32 %v1960_v15, %v1798_v8 }
 0x1ef   : > { %2728 = shalt.err (!%p2725_p7)
}
 0x1f0   : > { %s2729_s29 = scalar_lea.hbm %s3333_s25, 8192  ;;  %s2733_s7 = scalar_lea.hbm %s3608_s2, 16384 }
 0x1f1   : > { %p2730_p9 = scmp.ne.s32.totalorder %s3333_s25, %s2729_s29  ;;  %p2734_p5 = scmp.lt.u32.totalorder %s3333_s25, %s3608_s2 }
 0x1f2   : > { %p2735_p11 = scmp.lt.u32.totalorder %s2733_s7, %s2729_s29  ;;  %p2737_p4 = scmp.lt.u32.totalorder %s2729_s29, %s3333_s25 }
 0x1f3   : > { %p2731_p1 = pnand %p2730_p9, %p2941_p12 }
 0x1f4   : > { %p2736_p2 = por %p2735_p11, %p2734_p5 }
 0x1f5   : > { %p2732_p0 = pneg %p2731_p1 }
 0x1f6   : > { %p2738_p6 = por %p2737_p4, %p2736_p2 }
 0x1f8   : > { %p2739_p8 = pnand %p2738_p6, %p2732_p0 }
 0x1fa   : > { %2742 = shalt.err (!%p2739_p8)
}
 0x1fb   : > { %s2824_s18 = smov 128   ;;  %s2825_s20 = smov 8   ;;  %v1801_v35 = vmul.f32 %v3092_v53, %v3092_v53  ;;  %v1628_v39 = vadd.f32 %v1627_v19, %v3092_v53  ;;  %v1893_v45 = vadd.f32 %v1892_v33, %v1799_v18  ;;  %v1802_v54 = vmul.f32 %v3094_v57, %v3094_v57 }
 0x1fc   : > { %2453 = dma.vmem_to_hbm [thread:$0]  (%p2941_p12), %s3335_s8, 8192, %s3333_s25, %s2015_s5, %s2824_s18, %s2824_s18, %s2825_s20   ;;  %v1697_v31 = vadd.f32 %v1696_v42, %v3094_v57  ;;  %v1962_v55 = vadd.f32 %v1961_v30, %v1800_v47  ;;  %v1803_v60 = vmul.f32 %v3098_v63, %v3098_v63  ;;  %v1804_v10 = vmul.f32 %v3100_v4, %v3100_v4 }
 0x1fd   : > { %v1629_v25 = vadd.f32 %v1628_v39, %v3098_v63  ;;  %v1894_v32 = vadd.f32 %v1893_v45, %v1801_v35  ;;  %v1805_v53 = vmul.f32 %v3108_v13, %v3108_v13  ;;  %v1806_v57 = vmul.f32 %v3110_v17, %v3110_v17  ;;  %s2175_s8 = sshll.u32 %s2992_s6, 2  ;;  %s2414_s9 = sshll.u32 %s2868_s16, 6 }
 0x1fe   : > { %v1698_v48 = vadd.f32 %v1697_v31, %v3100_v4  ;;  %v1963_v24 = vadd.f32 %v1962_v55, %v1802_v54  ;;  %v1807_v63 = vmul.f32 %v3114_v23, %v3114_v23  ;;  %v1808_v4 = vmul.f32 %v3116_v28, %v3116_v28  ;;  %s215_s4 = scalar_lea.vmem [#allocation8], %s2175_s8  ;;  %s3562_s27 = scalar_lea.hbm %s3609_s3, %s2414_s9 }
 0x1ff   : > { %v1630_v2 = vadd.f32 %v1629_v25, %v3108_v13  ;;  %v1895_v8 = vadd.f32 %v1894_v32, %v1803_v60  ;;  %v1809_v13 = vmul.f32 %v3124_v40, %v3124_v40  ;;  %vm1999_vm0 = vcmask 1040384   ;;  %s2051_s25 = sshll.u32 %s215_s4, 4  ;;  %s2020_s28 = scalar_lea.sflag [#allocation9], %s2992_s6  ;;  %s3564_s25 = int_to_ptr.vmem [resolvable:$true] %s2051_s25 }
 0x200   : > { %v1699_v12 = vadd.f32 %v1698_v48, %v3110_v17  ;;  %v1964_v15 = vadd.f32 %v1963_v24, %v1804_v10  ;;  %v1810_v17 = vmul.f32 %v3126_v44, %v3126_v44  ;;  %s2743_s23 = scalar_lea.vmem %s3564_s25, 64  ;;  %s2826_s16 = smov [#allocation8]  }
 0x201   : > { %v1631_v18 = vadd.f32 %v1630_v2, %v3114_v23  ;;  %v1896_v19 = vadd.f32 %v1895_v8, %v1805_v53  ;;  %v1811_v23 = vmul.f32 %v3130_v51, %v3130_v51  ;;  %p2744_p10 = scmp.ne.s32.totalorder %s3564_s25, %s2743_s23  ;;  %s2747_s29 = sshll.u32 %s2826_s16, 4  ;;  %s2748_s29 = int_to_ptr.vmem [resolvable:$false] %s2747_s29 }
 0x202   : > { %v1700_v33 = vadd.f32 %v1699_v12, %v3116_v28  ;;  %v1965_v47 = vadd.f32 %v1964_v15, %v1806_v57  ;;  %v1812_v28 = vmul.f32 %v3132_v58, %v3132_v58  ;;  %s2749_s30 = scalar_lea.vmem %s2748_s29, 128  ;;  %p2750_p7 = scmp.lt.s32.totalorder %s3564_s25, %s2748_s29 }
 0x203   : > { %v1632_v42 = vadd.f32 %v1631_v18, %v3124_v40  ;;  %v1897_v30 = vadd.f32 %v1896_v19, %v1807_v63  ;;  %v1813_v40 = vmul.f32 %v3140_v5, %v3140_v5  ;;  %p2745_p13 = pnand %p2744_p10, %p2941_p12  ;;  %p2751_p9 = scmp.lt.s32.totalorder %s2749_s30, %s2743_s23 }
 0x204   : > { %v1701_v35 = vadd.f32 %v1700_v33, %v3126_v44  ;;  %v1966_v39 = vadd.f32 %v1965_v47, %v1808_v4  ;;  %v1814_v44 = vmul.f32 %v3142_v9, %v3142_v9 }
 0x205   : > { %v1633_v45 = vadd.f32 %v1632_v42, %v3130_v51  ;;  %v1898_v54 = vadd.f32 %v1897_v30, %v1809_v13  ;;  %v1815_v51 = vmul.f32 %v3146_v16, %v3146_v16  ;;  %p2746_p3 = pneg %p2745_p13  ;;  %p2752_p1 = por %p2751_p9, %p2750_p7 }
 0x206   : > { %v1702_v31 = vadd.f32 %v1701_v35, %v3132_v58  ;;  %v1967_v55 = vadd.f32 %v1966_v39, %v1810_v17  ;;  %v1816_v58 = vmul.f32 %v3148_v22, %v3148_v22 }
 0x207   : > { %v1899_v60 = vadd.f32 %v1898_v54, %v1811_v23  ;;  %v1634_v25 = vadd.f32 %v1633_v45, %v3140_v5  ;;  %v1817_v5 = vmul.f32 %v3156_v34, %v3156_v34  ;;  %p2753_p0 = pnand %p2752_p1, %p2746_p3 }
 0x208   : > { %v1968_v32 = vadd.f32 %v1967_v55, %v1812_v28  ;;  %v1703_v10 = vadd.f32 %v1702_v31, %v3142_v9  ;;  %v1818_v9 = vmul.f32 %v3158_v41, %v3158_v41 }
 0x209   : > { %v1635_v48 = vadd.f32 %v1634_v25, %v3146_v16  ;;  %v1900_v24 = vadd.f32 %v1899_v60, %v1813_v40  ;;  %v1819_v16 = vmul.f32 %v3162_v49, %v3162_v49  ;;  %v1829_v25 = vmul.f32 %v3204_v21, %v3204_v21 }
 0x20a   : > { %v1704_v53 = vadd.f32 %v1703_v10, %v3148_v22  ;;  %v1969_v2 = vadd.f32 %v1968_v32, %v1814_v44  ;;  %v1820_v22 = vmul.f32 %v3164_v56, %v3164_v56  ;;  %v1830_v32 = vmul.f32 %v3206_v29, %v3206_v29 }
 0x20b   : > { %v1636_v8 = vadd.f32 %v1635_v48, %v3156_v34  ;;  %v1901_v57 = vadd.f32 %v1900_v24, %v1815_v51  ;;  %v1821_v34 = vmul.f32 %v3172_v6, %v3172_v6  ;;  %v1831_v48 = vmul.f32 %v3210_v38, %v3210_v38 }
 0x20c   : > { %v1705_v12 = vadd.f32 %v1704_v53, %v3158_v41  ;;  %v1970_v15 = vadd.f32 %v1969_v2, %v1816_v58  ;;  %v1822_v41 = vmul.f32 %v3174_v11, %v3174_v11  ;;  %v1832_v58 = vmul.f32 %v3212_v52, %v3212_v52 }
 0x20d   : > { %v1637_v63 = vadd.f32 %v1636_v8, %v3162_v49  ;;  %v1902_v18 = vadd.f32 %v1901_v57, %v1817_v5  ;;  %v1823_v49 = vmul.f32 %v3178_v20, %v3178_v20  ;;  %v1833_v2 = vmul.f32 %v3220_v7, %v3220_v7 }
 0x20e   : > { %v1706_v19 = vadd.f32 %v1705_v12, %v3164_v56  ;;  %v1971_v4 = vadd.f32 %v1970_v15, %v1818_v9  ;;  %v1824_v56 = vmul.f32 %v3180_v27, %v3180_v27  ;;  %v1834_v8 = vmul.f32 %v3222_v14, %v3222_v14 }
 0x20f   : > { %v1638_v33 = vadd.f32 %v1637_v63, %v3172_v6  ;;  %v1903_v47 = vadd.f32 %v1902_v18, %v1819_v16  ;;  %v1825_v6 = vmul.f32 %v3188_v43, %v3188_v43  ;;  %v1835_v9 = vmul.f32 %v3226_v26, %v3226_v26 }
 0x210   : > { %v1707_v13 = vadd.f32 %v1706_v19, %v3174_v11  ;;  %v1972_v42 = vadd.f32 %v1971_v4, %v1820_v22  ;;  %v1826_v11 = vmul.f32 %v3190_v50, %v3190_v50  ;;  %v1836_v15 = vmul.f32 %v3228_v37, %v3228_v37 }
 0x211   : > { %v1639_v30 = vadd.f32 %v1638_v33, %v3178_v20  ;;  %v1904_v17 = vadd.f32 %v1903_v47, %v1821_v34  ;;  %v1827_v20 = vmul.f32 %v3194_v61, %v3194_v61 }
 0x212   : > { %v1708_v35 = vadd.f32 %v1707_v13, %v3180_v27  ;;  %v1973_v39 = vadd.f32 %v1972_v42, %v1822_v41  ;;  %v1828_v27 = vmul.f32 %v3196_v3, %v3196_v3 }
 0x213   : > { %v1640_v23 = vadd.f32 %v1639_v30, %v3188_v43  ;;  %v1905_v45 = vadd.f32 %v1904_v17, %v1823_v49  ;;  %v3682_v30 = vld [vmem:[#allocation18_spill] sm:$0xff] }
 0x214   : > { %v1709_v54 = vadd.f32 %v1708_v35, %v3190_v50  ;;  %v1974_v28 = vadd.f32 %v1973_v39, %v1824_v56  ;;  %v1841_v56 = vmul.f32 %v3682_v30, %v3682_v30  ;;  %v3683_v39 = vld [vmem:[#allocation19_spill] sm:$0xff] }
 0x215   : > { %v1641_v31 = vadd.f32 %v1640_v23, %v3194_v61  ;;  %v1906_v55 = vadd.f32 %v1905_v45, %v1825_v6  ;;  %v1842_v23 = vmul.f32 %v3683_v39, %v3683_v39 }
 0x216   : > { %v1710_v40 = vadd.f32 %v1709_v54, %v3196_v3  ;;  %v1975_v60 = vadd.f32 %v1974_v28, %v1826_v11  ;;  %v3684_v11 = vld [vmem:[#allocation20_spill] sm:$0xff] }
 0x217   : > { %v1642_v43 = vadd.f32 %v1641_v31, %v3204_v21  ;;  %v1907_v44 = vadd.f32 %v1906_v55, %v1827_v20  ;;  %v1843_v28 = vmul.f32 %v3684_v11, %v3684_v11  ;;  %v3685_v31 = vld [vmem:[#allocation21_spill] sm:$0xff] }
 0x218   : > { %v1711_v50 = vadd.f32 %v1710_v40, %v3206_v29  ;;  %v1976_v10 = vadd.f32 %v1975_v60, %v1828_v27  ;;  %v1844_v27 = vmul.f32 %v3685_v31, %v3685_v31  ;;  %v3686_v60 = vld [vmem:[#allocation22_spill] sm:$0xff] }
 0x219   : > { %v1908_v61 = vadd.f32 %v1907_v44, %v1829_v25  ;;  %v1643_v51 = vadd.f32 %v1642_v43, %v3210_v38  ;;  %v1845_v25 = vmul.f32 %v3686_v60, %v3686_v60 }
 0x21a   : > { %v1977_v3 = vadd.f32 %v1976_v10, %v1830_v32  ;;  %v1712_v24 = vadd.f32 %v1711_v50, %v3212_v52  ;;  %v3687_v50 = vld [vmem:[#allocation23_spill] sm:$0xff] }
 0x21b   : > { %v1909_v21 = vadd.f32 %v1908_v61, %v1831_v48  ;;  %v1644_v53 = vadd.f32 %v1643_v51, %v3220_v7  ;;  %v3678_v7 = vld [vmem:[#allocation14_spill] sm:$0xff]  ;;  %v1846_v10 = vmul.f32 %v3687_v50, %v3687_v50  ;;  %v3688_v51 = vld [vmem:[#allocation24_spill] sm:$0xff] }
 0x21c   : > { %v1978_v29 = vadd.f32 %v1977_v3, %v1832_v58  ;;  %v1713_v5 = vadd.f32 %v1712_v24, %v3222_v14  ;;  %v1837_v18 = vmul.f32 %v3678_v7, %v3678_v7  ;;  %v3679_v14 = vld [vmem:[#allocation15_spill] sm:$0xff]  ;;  %v1847_v3 = vmul.f32 %v3688_v51, %v3688_v51  ;;  %v3689_v58 = vld [vmem:[#allocation25_spill] sm:$0xff] }
 0x21d   : > { %v1910_v57 = vadd.f32 %v1909_v21, %v1833_v2  ;;  %v1645_v38 = vadd.f32 %v1644_v53, %v3226_v26  ;;  %v1838_v4 = vmul.f32 %v3679_v14, %v3679_v14  ;;  %v3680_v26 = vld [vmem:[#allocation16_spill] sm:$0xff]  ;;  %v1848_v53 = vmul.f32 %v3689_v58, %v3689_v58 }
 0x21e   : > { %v1979_v12 = vadd.f32 %v1978_v29, %v1834_v8  ;;  %v1714_v52 = vadd.f32 %v1713_v5, %v3228_v37  ;;  %v1839_v47 = vmul.f32 %v3680_v26, %v3680_v26  ;;  %v3681_v37 = vld [vmem:[#allocation17_spill] sm:$0xff]  ;;  %v3690_v29 = vld [vmem:[#allocation26_spill] sm:$0xff] }
 0x21f   : > { %v1911_v16 = vadd.f32 %v1910_v57, %v1835_v9  ;;  %v1646_v63 = vadd.f32 %v1645_v38, %v3678_v7  ;;  %v1840_v42 = vmul.f32 %v3681_v37, %v3681_v37  ;;  %v1849_v8 = vmul.f32 %v3690_v29, %v3690_v29  ;;  %v3691_v38 = vld [vmem:[#allocation27_spill] sm:$0xff] }
 0x220   : > { %v1980_v22 = vadd.f32 %v1979_v12, %v1836_v15  ;;  %v1715_v19 = vadd.f32 %v1714_v52, %v3679_v14  ;;  %v1850_v12 = vmul.f32 %v3691_v38, %v3691_v38 }
 0x221   : > { %v1912_v34 = vadd.f32 %v1911_v16, %v1837_v18  ;;  %v1647_v33 = vadd.f32 %v1646_v63, %v3680_v26  ;;  %v1851_v16 = vmul.f32 %v3290_v36, %v3290_v36  ;;  %v3692_v63 = vld [vmem:[#allocation28_spill] sm:$0xff] }
 0x222   : > { %v1981_v41 = vadd.f32 %v1980_v22, %v1838_v4  ;;  %v1716_v13 = vadd.f32 %v1715_v19, %v3681_v37  ;;  %v1852_v22 = vmul.f32 %v3692_v63, %v3692_v63  ;;  %v3693_v19 = vld [vmem:[#allocation29_spill] sm:$0xff] }
 0x223   : > { %v1913_v49 = vadd.f32 %v1912_v34, %v1839_v47  ;;  %v1648_v17 = vadd.f32 %v1647_v33, %v3682_v30  ;;  %v1853_v34 = vmul.f32 %v3693_v19, %v3693_v19  ;;  %v3694_v33 = vld [vmem:[#allocation30_spill] sm:$0xff]  ;;  %v3695_v30 = vld [vmem:[#allocation31_spill] sm:$0xff] }
 0x224   : > { %v1982_v35 = vadd.f32 %v1981_v41, %v1840_v42  ;;  %v1717_v6 = vadd.f32 %v1716_v13, %v3683_v39  ;;  %v1854_v41 = vmul.f32 %v3694_v33, %v3694_v33  ;;  %v1855_v13 = vmul.f32 %v3306_v46, %v3306_v46 }
 0x225   : > { %v1914_v45 = vadd.f32 %v1913_v49, %v1841_v56  ;;  %v1649_v54 = vadd.f32 %v1648_v17, %v3684_v11  ;;  %v1857_v42 = vmul.f32 %v3316_v0, %v3316_v0  ;;  %v1856_v56 = vmul.f32 %v3695_v30, %v3695_v30 }
 0x226   : > { %v1983_v20 = vadd.f32 %v1982_v35, %v1842_v23  ;;  %v1718_v55 = vadd.f32 %v1717_v6, %v3685_v31  ;;  %v1858_v35 = vmul.f32 %v3318_v59, %v3318_v59  ;;  %v1860_v31 = vmul.f32 %v3326_v62, %v3326_v62 }
 0x227   : > { %v1915_v40 = vadd.f32 %v1914_v45, %v1843_v28  ;;  %v1650_v43 = vadd.f32 %v1649_v54, %v3686_v60  ;;  %v1859_v54 = vmul.f32 %v3324_v1, %v3324_v1 }
 0x228   : > { %v1984_v44 = vadd.f32 %v1983_v20, %v1844_v27  ;;  %v1719_v32 = vadd.f32 %v1718_v55, %v3687_v50 }
 0x229   : > { %v1916_v61 = vadd.f32 %v1915_v40, %v1845_v25  ;;  %v1651_v48 = vadd.f32 %v1650_v43, %v3688_v51 }
 0x22a   : > { %v1985_v24 = vadd.f32 %v1984_v44, %v1846_v10  ;;  %v1720_v21 = vadd.f32 %v1719_v32, %v3689_v58 }
 0x22b   : > { %v1917_v2 = vadd.f32 %v1916_v61, %v1847_v3  ;;  %v1652_v5 = vadd.f32 %v1651_v48, %v3690_v29 }
 0x22c   : > { %v1986_v57 = vadd.f32 %v1985_v24, %v1848_v53  ;;  %v1721_v9 = vadd.f32 %v1720_v21, %v3691_v38 }
 0x22d   : > { %v1918_v52 = vadd.f32 %v1917_v2, %v1849_v8  ;;  %v1653_v15 = vadd.f32 %v1652_v5, %v3290_v36 }
 0x22e   : > { %v1987_v7 = vadd.f32 %v1986_v57, %v1850_v12  ;;  %v1722_v18 = vadd.f32 %v1721_v9, %v3692_v63 }
 0x22f   : > { %v1919_v14 = vadd.f32 %v1918_v52, %v1851_v16  ;;  %v1654_v4 = vadd.f32 %v1653_v15, %v3693_v19 }
 0x230   : > { %v1988_v26 = vadd.f32 %v1987_v7, %v1852_v22  ;;  %v1723_v47 = vadd.f32 %v1722_v18, %v3694_v33 }
 0x231   : > { %v1920_v37 = vadd.f32 %v1919_v14, %v1853_v34  ;;  %v1655_v36 = vadd.f32 %v1654_v4, %v3306_v46 }
 0x232   : > { %v1989_v49 = vadd.f32 %v1988_v26, %v1854_v41  ;;  %v1724_v17 = vadd.f32 %v1723_v47, %v3695_v30 }
 0x233   : > { %v1921_v39 = vadd.f32 %v1920_v37, %v1855_v13  ;;  %v1656_v6 = vadd.f32 %v1655_v36, %v3316_v0 }
 0x234   : > { %v1990_v23 = vadd.f32 %v1989_v49, %v1856_v56  ;;  %v1725_v45 = vadd.f32 %v1724_v17, %v3318_v59 }
 0x235   : > { %v1922_v11 = vadd.f32 %v1921_v39, %v1857_v42  ;;  %v1657_v46 = vadd.f32 %v1656_v6, %v3324_v1 }
 0x236   : > { %v1991_v28 = vadd.f32 %v1990_v23, %v1858_v35  ;;  %v1726_v20 = vadd.f32 %v1725_v45, %v3326_v62 }
 0x237   : > { %v1658_v55 = vrot.slane %v1657_v46, 4  ;;  %v1923_v27 = vadd.f32 %v1922_v11, %v1859_v54 }
 0x238   : > { %v1727_v40 = vrot.slane %v1726_v20, 4  ;;  %v1992_v0 = vadd.f32 %v1991_v28, %v1860_v31 }
 0x239   : > { %v1659_v60 = vadd.f32 %v1658_v55, %v1657_v46  ;;  %v1924_v43 = vrot.slane %v1923_v27, 4 }
 0x23a   : > { %v1728_v59 = vadd.f32 %v1727_v40, %v1726_v20  ;;  %v1993_v25 = vrot.slane %v1992_v0, 4 }
 0x23b   : > { %v1660_v44 = vrot.slane %v1659_v60, 2  ;;  %v1925_v50 = vadd.f32 %v1924_v43, %v1923_v27 }
 0x23c   : > { %v1729_v32 = vrot.slane %v1728_v59, 2  ;;  %v1994_v10 = vadd.f32 %v1993_v25, %v1992_v0 }
 0x23d   : > { %v1661_v1 = vadd.f32 %v1660_v44, %v1659_v60  ;;  %v1926_v61 = vrot.slane %v1925_v50, 2 }
 0x23e   : > { %v1730_v51 = vadd.f32 %v1729_v32, %v1728_v59  ;;  %v1995_v48 = vrot.slane %v1994_v10, 2 }
 0x23f   : > { %v1662_v62 = vrot.slane %v1661_v1, 1  ;;  %v1927_v3 = vadd.f32 %v1926_v61, %v1925_v50 }
 0x240   : > { %v1731_v24 = vrot.slane %v1730_v51, 1  ;;  %v1996_v58 = vadd.f32 %v1995_v48, %v1994_v10 }
 0x241   : > { %v1928_v21 = vrot.slane %v1927_v3, 1  ;;  %v1663_v2 = vadd.f32 %v1662_v62, %v1661_v1 }
 0x242   : > { %v1997_v53 = vrot.slane %v1996_v58, 1  ;;  %v1732_v5 = vadd.f32 %v1731_v24, %v1730_v51 }
 0x243   : > { %v1929_v29 = vadd.f32 %v1928_v21, %v1927_v3 }
 0x244   : > { %v1998_v8 = vadd.f32 %v1997_v53, %v1996_v58 }
 0x245   : > { %v2000_v57 = vsel %vm1999_vm0, %v1663_v2, %v1929_v29 }
 0x246   : > { %v2001_v38 = vsel %vm1999_vm0, %v1732_v5, %v1998_v8 }
 0x247   : > { %v2004_v9 = vcombine.low %v2000_v57, %v2001_v38 }
 0x249   : > { %2336 = vst.sshfl [vmem:[%s215_s4] sm:$0x33 pattern:$0x76325410] %v2004_v9 }
 0x24a   : > { %2756 = shalt.err (!%p2753_p0)
}
 0x24b   : > { %s2757_s6 = scalar_lea.hbm %s3562_s27, 64  ;;  %s2761_s10 = scalar_lea.hbm %s3609_s3, 128 }
 0x24c   : > { %p2758_p5 = scmp.ne.s32.totalorder %s3562_s27, %s2757_s6  ;;  %p2762_p4 = scmp.lt.u32.totalorder %s3562_s27, %s3609_s3 }
 0x24d   : > { %p2763_p6 = scmp.lt.u32.totalorder %s2761_s10, %s2757_s6  ;;  %p2765_p10 = scmp.lt.u32.totalorder %s2757_s6, %s3562_s27 }
 0x24e   : > { %p2759_p11 = pnand %p2758_p5, %p2941_p12 }
 0x24f   : > { %p2764_p8 = por %p2763_p6, %p2762_p4 }
 0x250   : > { %p2760_p2 = pneg %p2759_p11 }
 0x251   : > { %p2766_p13 = por %p2765_p10, %p2764_p8 }
 0x253   : > { %p2767_p3 = pnand %p2766_p13, %p2760_p2 }
 0x255   : > { %2770 = shalt.err (!%p2767_p3)
}
 0x256   : > { %2454 = dma.vmem_to_hbm [thread:$0]  (%p2941_p12), %s3564_s25, 64, %s3562_s27, %s2020_s28  }
 0x257 PF: > { %s2063_s20 = sand.u32 1, %s2805_s12   ;;  %p3696_p7 = scmp.ne.s32.totalorder %s3650_s19, 0 }
 0x258   : > { %p3697_p9 = scmp.ge.s32.totalorder %s2817_s15, 2  ;;  %s2064_s8 = scalar_lea.sflag [#allocation4], %s2063_s20 }
 0x25a   : > { %p2466_p1 = pnand %p3697_p9, %p3696_p7 }
 0x25c   : > { %2796 = dma.done.wait (!%p2466_p1), %s2064_s8, 8192  }
 0x25d   : > { %2798 = vsyncadd (!%p2466_p1), %s2064_s8, 4294959104  ;;  %s2073_s9 = scalar_lea.sflag [#allocation9], %s2063_s20 }
 0x25e   : > { %2800 = dma.done.wait (!%p2466_p1), %s2073_s9, 64  }
 0x25f   : > { %2802 = vsyncadd (!%p2466_p1), %s2073_s9, 4294967232  ;;  %p21_p12 = scmp.ge.s32.totalorder %s2903_s24, 4   ;;  %s3698_s12 = smov %s2809_s13 }
 0x260   : > { %s3699_s13 = smov %s2813_s14  ;;  %s3700_s14 = smov %s2937_s17 }
 0x261   : > { %s3701_s15 = smov %s2903_s24  ;;  %23 = sbr.rel (!%p21_p12) target bundleno = 8 (0x8), region = 94 }
 0x268   :  { %2078 = vsyncpa [#allocation3], 1 }
 0x269   :  { %2080 = vsyncpa [#allocation3 + $0x1], 1 }
 0x26a   :  { %2081 = vsyncpa [#allocation6], 1 }
 0x26b   :  { %2082 = vsyncpa [#allocation4], 1 }
 0x26c   :  { %2084 = vsyncpa [#allocation4 + $0x1], 1 }
 0x26d   :  { %2085 = vsyncpa [#allocation9], 1 }
 0x26e   :  { %2087 = vsyncpa [#allocation9 + $0x1], 1 }

</bundles_post_ra>
